<compile_context>
chip_gen: v5e
topology: v5e:2x2
jax: 0.10.0
libtpu: 0.0.40
codegen_flags: <defaults>
</compile_context>

<pallas_src>
import functools

import jax
import jax.numpy as jnp
from jax import lax
from jax.experimental import pallas as pl
from jax.experimental.pallas import tpu as pltpu


def _round_up(x, m):
    return ((x + m - 1) // m) * m


def a2c_loss_kernel(x_ref, lab_ref, rows_ref, pcnt_ref, pT_ref, labp_ref,
                    mask_ref, oneh_ref, out_ref, ap_acc, an_acc, cn_acc,
                    *, bias, use_bf16):
    eps = 1e-8
    j = pl.program_id(1)

    @pl.when(j == 0)
    def _init():
        ap_acc[...] = jnp.zeros_like(ap_acc)
        an_acc[...] = jnp.zeros_like(an_acc)
        cn_acc[...] = jnp.zeros_like(cn_acc)

    # ---- cosine distance tile: [TN, TM] ------------------------------------
    x = x_ref[...]                                              # [TN, D]
    inv_n = lax.rsqrt(jnp.maximum(jnp.sum(x * x, axis=-1, keepdims=True),
                                  eps * eps))                   # == 1/max(||x||, eps)
    xn = x * inv_n
    pT = pT_ref[...]                                            # [D, TM], pre-normalized
    if use_bf16:   # static flag; only for large D (MXU bf16 path)
        xn = xn.astype(jnp.bfloat16)
        pT = pT.astype(jnp.bfloat16)
    sim = jnp.dot(xn, pT, preferred_element_type=jnp.float32)   # MXU, [TN, TM]
    dist = 1.0 - sim

    # ---- masks (positives / negatives, restricted to valid/real proxies) ----
    eq = (lab_ref[...] == labp_ref[...]).astype(jnp.float32)    # [TN, TM]
    mask = mask_ref[...]                                        # [1, TM]
    pos = eq * mask
    neg = (1.0 - eq) * mask

    # ---- alpha reconstructed on the MXU: rows(=0.5*table[labels]) @ onehot ---
    alpha = jnp.dot(rows_ref[...], oneh_ref[...],
                    preferred_element_type=jnp.float32) + bias  # [TN, TM]

    # ---- accumulate row-wise partial sums over the M chunks -----------------
    ap_acc[...] += jnp.sum(jnp.maximum(dist - 0.05, 0.0) * pos,
                           axis=-1, keepdims=True)
    cond = neg * (dist < alpha).astype(jnp.float32)
    an_acc[...] += jnp.sum(cond * (alpha - dist), axis=-1, keepdims=True)
    cn_acc[...] += jnp.sum(cond, axis=-1, keepdims=True)

    @pl.when(j == pl.num_programs(1) - 1)
    def _finalize():
        loss_ap = ap_acc[...] * pl.reciprocal(pcnt_ref[...] + 1e-5)
        loss_an = an_acc[...] * pl.reciprocal(cn_acc[...] + 1e-5)
        out_ref[...] = loss_ap + loss_an


def a2c_loss(inst_embed, labels, inst_proxy, labels_proxy, margin, alpha,
             real_list, is_real, att_distance, bias=0.4):
    """Pallas implementation of A2C_loss.forward. `margin` / `alpha` args are
    unused, matching the PyTorch reference (alpha is recomputed in the loss)."""
    del margin, alpha
    f32 = jnp.float32
    N, D = inst_embed.shape
    M = inst_proxy.shape[0]
    C = att_distance.shape[0]
    eps = 1e-8

    x = inst_embed.astype(f32)
    labels_i = labels.astype(jnp.int32)
    labp_i = labels_proxy.astype(jnp.int32)

    # Grid-invariant prep (tiny, O(N*C + M*D)); NOT the N*M gather.
    p = inst_proxy.astype(f32)
    pT = (p / jnp.maximum(jnp.linalg.norm(p, axis=-1, keepdims=True), eps)).T  # [D, M]
    rows = att_distance.astype(f32)[labels_i] * 0.5                            # [N, C]
    onehotT = jax.nn.one_hot(labp_i, C, dtype=f32).T                           # [C, M]
    valid = real_list.astype(f32) if is_real else jnp.ones((M,), f32)          # [M]
    pos_cnt = jnp.sum((labels_i[:, None] == labp_i[None, :]).astype(f32)
                      * valid[None, :], axis=1, keepdims=True)                 # [N, 1]

    # ---- tiling (small blocks; well under scoped-VMEM defaults on all gens) --
    TN = min(128, _round_up(N, 8))
    N_pad = _round_up(N, TN)
    M_pad = _round_up(M, 128)
    if M_pad % 512 == 0:
        TM = 512
    elif M_pad % 256 == 0:
        TM = 256
    else:
        TM = 128
    TM = min(TM, M_pad)
    C_pad = _round_up(C, 128)
    grid = (N_pad // TN, M_pad // TM)

    def pad2(a, r, c, value=0):
        return jnp.pad(a, ((0, r - a.shape[0]), (0, c - a.shape[1])),
                       constant_values=value)

    x_p = pad2(x, N_pad, D)
    lab_p = pad2(labels_i.reshape(N, 1), N_pad, 1, value=-1)
    rows_p = pad2(rows, N_pad, C_pad)
    pcnt_p = pad2(pos_cnt, N_pad, 1)
    pT_p = pad2(pT, D, M_pad)
    labp_p = pad2(labp_i.reshape(1, M), 1, M_pad, value=-2)
    valid_p = pad2(valid.reshape(1, M), 1, M_pad)   # zero mask on padded proxies
    oneh_p = pad2(onehotT, C_pad, M_pad)

    kernel = functools.partial(a2c_loss_kernel, bias=float(bias),
                               use_bf16=bool(D >= 128))

    grid_spec = pltpu.PrefetchScalarGridSpec(
        num_scalar_prefetch=0,
        grid=grid,
        in_specs=[
            pl.BlockSpec((TN, D), lambda i, j: (i, 0)),        # inst_embed tile
            pl.BlockSpec((TN, 1), lambda i, j: (i, 0)),        # labels
            pl.BlockSpec((TN, C_pad), lambda i, j: (i, 0)),    # 0.5*att_distance[labels]
            pl.BlockSpec((TN, 1), lambda i, j: (i, 0)),        # pos_cnt
            pl.BlockSpec((D, TM), lambda i, j: (0, j)),        # normalized proxy^T
            pl.BlockSpec((1, TM), lambda i, j: (0, j)),        # labels_proxy
            pl.BlockSpec((1, TM), lambda i, j: (0, j)),        # valid/real mask
            pl.BlockSpec((C_pad, TM), lambda i, j: (0, j)),    # one_hot(labels_proxy)^T
        ],
        out_specs=pl.BlockSpec((TN, 1), lambda i, j: (i, 0)),  # per-row loss
        scratch_shapes=[pltpu.VMEM((TN, 1), f32)] * 3,
    )

    def tile_bytes(r, c):
        return _round_up(r, 8) * _round_up(c, 128) * 4

    vmem_est = (2 * (tile_bytes(TN, D) + 2 * tile_bytes(TN, 1)
                     + tile_bytes(TN, C_pad) + tile_bytes(D, TM)
                     + 2 * tile_bytes(1, TM) + tile_bytes(C_pad, TM)
                     + tile_bytes(TN, 1))
                + 3 * tile_bytes(TN, 1))
    vmem_limit = int(min(max(2 * vmem_est, 8 * 1024 * 1024), 32 * 1024 * 1024))

    cost = pl.CostEstimate(
        flops=int(2 * N_pad * M_pad * (D + C_pad) + 12 * N_pad * M_pad),
        transcendentals=int(3 * N_pad),
        bytes_accessed=int(4 * (N_pad * (D + C_pad + 3)
                                + M_pad * (D + C_pad + 2))),
    )

    out = pl.pallas_call(
        kernel,
        out_shape=jax.ShapeDtypeStruct((N_pad, 1), f32),
        grid_spec=grid_spec,
        compiler_params=pltpu.CompilerParams(
            dimension_semantics=("parallel", "arbitrary"),
            vmem_limit_bytes=vmem_limit,
        ),
        cost_estimate=cost,
    )(x_p, lab_p, rows_p, pcnt_p, pT_p, labp_p, valid_p, oneh_p)

    return jnp.sum(out[:N, 0]) / N


def a2c_loss_ref(inst_embed, labels, inst_proxy, labels_proxy, real_list,
                 is_real, att_distance, bias):
    """Pure-JAX reference (mirrors the PyTorch loop with masked reductions)."""
    eps = 1e-8
    xn = inst_embed / jnp.maximum(
        jnp.linalg.norm(inst_embed, axis=-1, keepdims=True), eps)
    pn = inst_proxy / jnp.maximum(
        jnp.linalg.norm(inst_proxy, axis=-1, keepdims=True), eps)
    dist = 1.0 - xn @ pn.T
    pos = (labels[:, None] == labels_proxy[None, :]).astype(jnp.float32)
    neg = 1.0 - pos
    if is_real:
        pos = pos * real_list[None, :]
        neg = neg * real_list[None, :]
    alpha = att_distance[labels][:, labels_proxy] * 0.5 + bias
    loss_ap = jnp.sum(jnp.maximum(dist - 0.05, 0.0) * pos, -1) / (jnp.sum(pos, -1) + 1e-5)
    cond = neg * (dist < alpha).astype(jnp.float32)
    loss_an = jnp.sum(cond * (alpha - dist), -1) / (jnp.sum(cond, -1) + 1e-5)
    return jnp.mean(loss_ap + loss_an)


if __name__ == "__main__":
    key = jax.random.PRNGKey(0)
    N, M, D, C = 64, 24, 32, 5        # instances, proxies, embed dim, classes
    k1, k2, k3, k4, k5, k6 = jax.random.split(key, 6)

    inst_embed = jax.random.normal(k1, (N, D), dtype=jnp.float32)
    inst_proxy = jax.random.normal(k2, (M, D), dtype=jnp.float32)
    labels = jax.random.randint(k3, (N,), 0, C, dtype=jnp.int32)
    labels_proxy = jax.random.randint(k4, (M,), 0, C, dtype=jnp.int32)
    real_list = jax.random.bernoulli(k5, 0.7, (M,)).astype(jnp.float32)
    att_distance = jax.random.uniform(k6, (C, C), dtype=jnp.float32)
    att_distance = 0.5 * (att_distance + att_distance.T)   # symmetric distances

    margin, alpha_arg = 0.3, 1.0      # unused by the forward (matches PyTorch)
    is_real = True
    bias = 0.4                        # module "parameter"

    loss = a2c_loss(inst_embed, labels, inst_proxy, labels_proxy,
                    margin, alpha_arg, real_list, is_real, att_distance, bias=bias)
    loss = jax.block_until_ready(loss)

    ref = a2c_loss_ref(inst_embed, labels, inst_proxy, labels_proxy,
                       real_list, is_real, att_distance, bias)
    ref = jax.block_until_ready(ref)

    assert jnp.allclose(loss, ref, rtol=1e-4, atol=1e-4), (loss, ref)
    print("KERNEL_OK")
</pallas_src>

<mosaic_0001>
module attributes {stable_mosaic.version = 11 : i64} {
  func.func @a2c_loss_kernel(%arg0: i32, %arg1: i32, %arg2: memref<64x32xf32, #tpu.memory_space<vmem>>, %arg3: memref<64x1xi32, #tpu.memory_space<vmem>>, %arg4: memref<64x128xf32, #tpu.memory_space<vmem>>, %arg5: memref<64x1xf32, #tpu.memory_space<vmem>>, %arg6: memref<32x128xf32, #tpu.memory_space<vmem>>, %arg7: memref<1x128xi32, #tpu.memory_space<vmem>>, %arg8: memref<1x128xf32, #tpu.memory_space<vmem>>, %arg9: memref<128x128xf32, #tpu.memory_space<vmem>>, %arg10: memref<64x1xf32, #tpu.memory_space<vmem>>, %arg11: memref<64x1xf32, #tpu.memory_space<vmem>>, %arg12: memref<64x1xf32, #tpu.memory_space<vmem>>, %arg13: memref<64x1xf32, #tpu.memory_space<vmem>>) attributes {dimension_semantics = [#tpu.dimension_semantics<parallel>, #tpu.dimension_semantics<arbitrary>], iteration_bounds = array<i64: 1, 1>, scalar_prefetch = 0 : i64, scratch_operands = 3 : i64, tpu.core_type = #tpu.core_type<tc>, window_params = [{transform_indices = @transform_0, window_bounds = array<i64: 64, 32>}, {transform_indices = @transform_1, window_bounds = array<i64: 64, 1>}, {transform_indices = @transform_2, window_bounds = array<i64: 64, 128>}, {transform_indices = @transform_3, window_bounds = array<i64: 64, 1>}, {transform_indices = @transform_4, window_bounds = array<i64: 32, 128>}, {transform_indices = @transform_5, window_bounds = array<i64: 1, 128>}, {transform_indices = @transform_6, window_bounds = array<i64: 1, 128>}, {transform_indices = @transform_7, window_bounds = array<i64: 128, 128>}, {transform_indices = @transform_8, window_bounds = array<i64: 64, 1>}]} {
    %c0_i32 = arith.constant 0 : i32
    %0 = arith.cmpi eq, %arg1, %c0_i32 : i32
    %1 = arith.extui %0 : i1 to i32
    %c0_i32_0 = arith.constant 0 : i32
    %2 = arith.cmpi ne, %1, %c0_i32_0 : i32
    scf.if %2 {
      %cst_39 = arith.constant 0.000000e+00 : f32
      %64 = vector.broadcast %cst_39 : f32 to vector<64x1xf32>
      %c0_40 = arith.constant 0 : index
      %c0_41 = arith.constant 0 : index
      %65 = vector.load %arg11[%c0_40, %c0_41] : memref<64x1xf32, #tpu.memory_space<vmem>>, vector<64x1xf32>
      tpu.vector_store %arg11[%c0_40, %c0_41], %64 {strides = array<i32>} : memref<64x1xf32, #tpu.memory_space<vmem>>, vector<64x1xf32>,
      %cst_42 = arith.constant 0.000000e+00 : f32
      %66 = vector.broadcast %cst_42 : f32 to vector<64x1xf32>
      %c0_43 = arith.constant 0 : index
      %c0_44 = arith.constant 0 : index
      %67 = vector.load %arg12[%c0_43, %c0_44] : memref<64x1xf32, #tpu.memory_space<vmem>>, vector<64x1xf32>
      tpu.vector_store %arg12[%c0_43, %c0_44], %66 {strides = array<i32>} : memref<64x1xf32, #tpu.memory_space<vmem>>, vector<64x1xf32>,
      %cst_45 = arith.constant 0.000000e+00 : f32
      %68 = vector.broadcast %cst_45 : f32 to vector<64x1xf32>
      %c0_46 = arith.constant 0 : index
      %c0_47 = arith.constant 0 : index
      %69 = vector.load %arg13[%c0_46, %c0_47] : memref<64x1xf32, #tpu.memory_space<vmem>>, vector<64x1xf32>
      tpu.vector_store %arg13[%c0_46, %c0_47], %68 {strides = array<i32>} : memref<64x1xf32, #tpu.memory_space<vmem>>, vector<64x1xf32>,
    } else {
    }
    %c0 = arith.constant 0 : index
    %c0_1 = arith.constant 0 : index
    %3 = vector.load %arg2[%c0, %c0_1] : memref<64x32xf32, #tpu.memory_space<vmem>>, vector<64x32xf32>
    %4 = arith.mulf %3, %3 : vector<64x32xf32>
    %cst = arith.constant dense<0.000000e+00> : vector<64xf32>
    %5 = vector.multi_reduction <add>, %4, %cst [1] : vector<64x32xf32> to vector<64xf32>
    %6 = vector.shape_cast %5 : vector<64xf32> to vector<64x1xf32>
    %cst_2 = arith.constant 1.000000e-16 : f32
    %7 = vector.broadcast %cst_2 : f32 to vector<64x1xf32>
    %8 = arith.maximumf %6, %7 : vector<64x1xf32>
    %9 = math.rsqrt %8 : vector<64x1xf32>
    %10 = vector.broadcast %9 : vector<64x1xf32> to vector<64x32xf32>
    %11 = arith.mulf %3, %10 : vector<64x32xf32>
    %c0_3 = arith.constant 0 : index
    %c0_4 = arith.constant 0 : index
    %12 = vector.load %arg6[%c0_3, %c0_4] : memref<32x128xf32, #tpu.memory_space<vmem>>, vector<32x128xf32>
    %cst_5 = arith.constant dense<0.000000e+00> : vector<64x128xf32>
    %13 = tpu.matmul %11, %12, %cst_5 {dimension_numbers = #tpu.dot_dimension_numbers<[1], [0], [0], [1], [0, 0, 1, 1], [], []>} : vector<64x32xf32>, vector<32x128xf32>, vector<64x128xf32> -> vector<64x128xf32>
    %cst_6 = arith.constant 1.000000e+00 : f32
    %14 = vector.broadcast %cst_6 : f32 to vector<64x128xf32>
    %15 = arith.subf %14, %13 : vector<64x128xf32>
    %c0_7 = arith.constant 0 : index
    %c0_8 = arith.constant 0 : index
    %16 = vector.load %arg3[%c0_7, %c0_8] : memref<64x1xi32, #tpu.memory_space<vmem>>, vector<64x1xi32>
    %c0_9 = arith.constant 0 : index
    %c0_10 = arith.constant 0 : index
    %17 = vector.load %arg7[%c0_9, %c0_10] : memref<1x128xi32, #tpu.memory_space<vmem>>, vector<1x128xi32>
    %18 = vector.broadcast %16 : vector<64x1xi32> to vector<64x128xi32>
    %19 = vector.broadcast %17 : vector<1x128xi32> to vector<64x128xi32>
    %20 = arith.cmpi eq, %18, %19 : vector<64x128xi32>
    %21 = arith.extui %20 : vector<64x128xi1> to vector<64x128xi32>
    %22 = arith.sitofp %21 : vector<64x128xi32> to vector<64x128xf32>
    %c0_11 = arith.constant 0 : index
    %c0_12 = arith.constant 0 : index
    %23 = vector.load %arg8[%c0_11, %c0_12] : memref<1x128xf32, #tpu.memory_space<vmem>>, vector<1x128xf32>
    %24 = vector.broadcast %23 : vector<1x128xf32> to vector<64x128xf32>
    %25 = arith.mulf %22, %24 : vector<64x128xf32>
    %cst_13 = arith.constant 1.000000e+00 : f32
    %26 = vector.broadcast %cst_13 : f32 to vector<64x128xf32>
    %27 = arith.subf %26, %22 : vector<64x128xf32>
    %28 = vector.broadcast %23 : vector<1x128xf32> to vector<64x128xf32>
    %29 = arith.mulf %27, %28 : vector<64x128xf32>
    %c0_14 = arith.constant 0 : index
    %c0_15 = arith.constant 0 : index
    %30 = vector.load %arg4[%c0_14, %c0_15] : memref<64x128xf32, #tpu.memory_space<vmem>>, vector<64x128xf32>
    %c0_16 = arith.constant 0 : index
    %c0_17 = arith.constant 0 : index
    %31 = vector.load %arg9[%c0_16, %c0_17] : memref<128x128xf32, #tpu.memory_space<vmem>>, vector<128x128xf32>
    %cst_18 = arith.constant dense<0.000000e+00> : vector<64x128xf32>
    %32 = tpu.matmul %30, %31, %cst_18 {dimension_numbers = #tpu.dot_dimension_numbers<[1], [0], [0], [1], [0, 0, 1, 1], [], []>} : vector<64x128xf32>, vector<128x128xf32>, vector<64x128xf32> -> vector<64x128xf32>
    %cst_19 = arith.constant 4.000000e-01 : f32
    %33 = vector.broadcast %cst_19 : f32 to vector<64x128xf32>
    %34 = arith.addf %32, %33 : vector<64x128xf32>
    %c0_20 = arith.constant 0 : index
    %c0_21 = arith.constant 0 : index
    %35 = vector.load %arg11[%c0_20, %c0_21] : memref<64x1xf32, #tpu.memory_space<vmem>>, vector<64x1xf32>
    %cst_22 = arith.constant 5.000000e-02 : f32
    %36 = vector.broadcast %cst_22 : f32 to vector<64x128xf32>
    %37 = arith.subf %15, %36 : vector<64x128xf32>
    %cst_23 = arith.constant 0.000000e+00 : f32
    %38 = vector.broadcast %cst_23 : f32 to vector<64x128xf32>
    %39 = arith.maximumf %37, %38 : vector<64x128xf32>
    %40 = arith.mulf %39, %25 : vector<64x128xf32>
    %cst_24 = arith.constant dense<0.000000e+00> : vector<64xf32>
    %41 = vector.multi_reduction <add>, %40, %cst_24 [1] : vector<64x128xf32> to vector<64xf32>
    %42 = vector.shape_cast %41 : vector<64xf32> to vector<64x1xf32>
    %43 = arith.addf %35, %42 : vector<64x1xf32>
    %c0_25 = arith.constant 0 : index
    %c0_26 = arith.constant 0 : index
    %44 = vector.load %arg11[%c0_25, %c0_26] : memref<64x1xf32, #tpu.memory_space<vmem>>, vector<64x1xf32>
    tpu.vector_store %arg11[%c0_25, %c0_26], %43 {strides = array<i32>} : memref<64x1xf32, #tpu.memory_space<vmem>>, vector<64x1xf32>,
    %45 = arith.cmpf olt, %15, %34 : vector<64x128xf32>
    %46 = arith.extui %45 : vector<64x128xi1> to vector<64x128xi32>
    %47 = arith.sitofp %46 : vector<64x128xi32> to vector<64x128xf32>
    %48 = arith.mulf %29, %47 : vector<64x128xf32>
    %c0_27 = arith.constant 0 : index
    %c0_28 = arith.constant 0 : index
    %49 = vector.load %arg12[%c0_27, %c0_28] : memref<64x1xf32, #tpu.memory_space<vmem>>, vector<64x1xf32>
    %50 = arith.subf %34, %15 : vector<64x128xf32>
    %51 = arith.mulf %48, %50 : vector<64x128xf32>
    %cst_29 = arith.constant dense<0.000000e+00> : vector<64xf32>
    %52 = vector.multi_reduction <add>, %51, %cst_29 [1] : vector<64x128xf32> to vector<64xf32>
    %53 = vector.shape_cast %52 : vector<64xf32> to vector<64x1xf32>
    %54 = arith.addf %49, %53 : vector<64x1xf32>
    %c0_30 = arith.constant 0 : index
    %c0_31 = arith.constant 0 : index
    %55 = vector.load %arg12[%c0_30, %c0_31] : memref<64x1xf32, #tpu.memory_space<vmem>>, vector<64x1xf32>
    tpu.vector_store %arg12[%c0_30, %c0_31], %54 {strides = array<i32>} : memref<64x1xf32, #tpu.memory_space<vmem>>, vector<64x1xf32>,
    %c0_32 = arith.constant 0 : index
    %c0_33 = arith.constant 0 : index
    %56 = vector.load %arg13[%c0_32, %c0_33] : memref<64x1xf32, #tpu.memory_space<vmem>>, vector<64x1xf32>
    %cst_34 = arith.constant dense<0.000000e+00> : vector<64xf32>
    %57 = vector.multi_reduction <add>, %48, %cst_34 [1] : vector<64x128xf32> to vector<64xf32>
    %58 = vector.shape_cast %57 : vector<64xf32> to vector<64x1xf32>
    %59 = arith.addf %56, %58 : vector<64x1xf32>
    %c0_35 = arith.constant 0 : index
    %c0_36 = arith.constant 0 : index
    %60 = vector.load %arg13[%c0_35, %c0_36] : memref<64x1xf32, #tpu.memory_space<vmem>>, vector<64x1xf32>
    tpu.vector_store %arg13[%c0_35, %c0_36], %59 {strides = array<i32>} : memref<64x1xf32, #tpu.memory_space<vmem>>, vector<64x1xf32>,
    %c0_i32_37 = arith.constant 0 : i32
    %61 = arith.cmpi eq, %arg1, %c0_i32_37 : i32
    %62 = arith.extui %61 : i1 to i32
    %c0_i32_38 = arith.constant 0 : i32
    %63 = arith.cmpi ne, %62, %c0_i32_38 : i32
    scf.if %63 {
      %c0_39 = arith.constant 0 : index
      %c0_40 = arith.constant 0 : index
      %64 = vector.load %arg11[%c0_39, %c0_40] : memref<64x1xf32, #tpu.memory_space<vmem>>, vector<64x1xf32>
      %c0_41 = arith.constant 0 : index
      %c0_42 = arith.constant 0 : index
      %65 = vector.load %arg5[%c0_41, %c0_42] : memref<64x1xf32, #tpu.memory_space<vmem>>, vector<64x1xf32>
      %cst_43 = arith.constant 9.99999974E-6 : f32
      %66 = vector.broadcast %cst_43 : f32 to vector<64x1xf32>
      %67 = arith.addf %65, %66 : vector<64x1xf32>
      %68 = tpu.reciprocal %67 : vector<64x1xf32> -> vector<64x1xf32>
      %69 = arith.mulf %64, %68 : vector<64x1xf32>
      %c0_44 = arith.constant 0 : index
      %c0_45 = arith.constant 0 : index
      %70 = vector.load %arg12[%c0_44, %c0_45] : memref<64x1xf32, #tpu.memory_space<vmem>>, vector<64x1xf32>
      %c0_46 = arith.constant 0 : index
      %c0_47 = arith.constant 0 : index
      %71 = vector.load %arg13[%c0_46, %c0_47] : memref<64x1xf32, #tpu.memory_space<vmem>>, vector<64x1xf32>
      %cst_48 = arith.constant 9.99999974E-6 : f32
      %72 = vector.broadcast %cst_48 : f32 to vector<64x1xf32>
      %73 = arith.addf %71, %72 : vector<64x1xf32>
      %74 = tpu.reciprocal %73 : vector<64x1xf32> -> vector<64x1xf32>
      %75 = arith.mulf %70, %74 : vector<64x1xf32>
      %76 = arith.addf %69, %75 : vector<64x1xf32>
      %c0_49 = arith.constant 0 : index
      %c0_50 = arith.constant 0 : index
      %77 = vector.load %arg10[%c0_49, %c0_50] : memref<64x1xf32, #tpu.memory_space<vmem>>, vector<64x1xf32>
      tpu.vector_store %arg10[%c0_49, %c0_50], %76 {strides = array<i32>} : memref<64x1xf32, #tpu.memory_space<vmem>>, vector<64x1xf32>,
    } else {
    }
    return
  }
  func.func @transform_0(%arg0: i32, %arg1: i32) -> (i32, i32) {
    %c0_i32 = arith.constant 0 : i32
    %c0_i32_0 = arith.constant 0 : i32
    return %arg0, %c0_i32 : i32, i32
  }
  func.func @transform_1(%arg0: i32, %arg1: i32) -> (i32, i32) {
    %c0_i32 = arith.constant 0 : i32
    %c0_i32_0 = arith.constant 0 : i32
    return %arg0, %c0_i32 : i32, i32
  }
  func.func @transform_2(%arg0: i32, %arg1: i32) -> (i32, i32) {
    %c0_i32 = arith.constant 0 : i32
    %c0_i32_0 = arith.constant 0 : i32
    return %arg0, %c0_i32 : i32, i32
  }
  func.func @transform_3(%arg0: i32, %arg1: i32) -> (i32, i32) {
    %c0_i32 = arith.constant 0 : i32
    %c0_i32_0 = arith.constant 0 : i32
    return %arg0, %c0_i32 : i32, i32
  }
  func.func @transform_4(%arg0: i32, %arg1: i32) -> (i32, i32) {
    %c0_i32 = arith.constant 0 : i32
    %c0_i32_0 = arith.constant 0 : i32
    return %c0_i32, %arg1 : i32, i32
  }
  func.func @transform_5(%arg0: i32, %arg1: i32) -> (i32, i32) {
    %c0_i32 = arith.constant 0 : i32
    %c0_i32_0 = arith.constant 0 : i32
    return %c0_i32, %arg1 : i32, i32
  }
  func.func @transform_6(%arg0: i32, %arg1: i32) -> (i32, i32) {
    %c0_i32 = arith.constant 0 : i32
    %c0_i32_0 = arith.constant 0 : i32
    return %c0_i32, %arg1 : i32, i32
  }
  func.func @transform_7(%arg0: i32, %arg1: i32) -> (i32, i32) {
    %c0_i32 = arith.constant 0 : i32
    %c0_i32_0 = arith.constant 0 : i32
    return %c0_i32, %arg1 : i32, i32
  }
  func.func @transform_8(%arg0: i32, %arg1: i32) -> (i32, i32) {
    %c0_i32 = arith.constant 0 : i32
    %c0_i32_0 = arith.constant 0 : i32
    return %arg0, %c0_i32 : i32, i32
  }
}

</mosaic_0001>

<bundles_post_ra>
// kernel: tpu_custom_call.1
= control target key start
LH: loop header
LB: loop body
LE: loop exit
PB: predicated region body
PF: predicated region fallthrough
CT: control target
= control target key end

     0   :  { %vm74_vm0 = vcmask 261120   ;;  %v1050_v45 = vmov 0   ;;  %s2077_s0 = inlined_call_operand.vmem [shape: f32[64,32], index: 0, kind: input, shape index: {}]   ;;  %s2078_s7 = inlined_call_operand.vmem [shape: f32[128,128], index: 7, kind: input, shape index: {}]   ;;  %s2079_s5 = inlined_call_operand.vmem [shape: s32[1,128], index: 5, kind: input, shape index: {}]   ;;  %s2080_s6 = inlined_call_operand.vmem [shape: f32[1,128], index: 6, kind: input, shape index: {}]   ;;  %s2081_s4 = inlined_call_operand.vmem [shape: f32[32,128], index: 4, kind: input, shape index: {}]   ;;  %s2082_s2 = inlined_call_operand.vmem [shape: f32[64,128], index: 2, kind: input, shape index: {}]   ;;  %s2083_s1 = inlined_call_operand.vmem [shape: s32[64,1], index: 1, kind: input, shape index: {}]   ;;  %s2084_s3 = inlined_call_operand.vmem [shape: f32[64,1], index: 3, kind: input, shape index: {}]   ;;  %s2085_s8 = inlined_call_operand.vmem [shape: f32[64,1], index: 8, kind: output, shape index: {}]  }
   0x1   :  { %v1100_v0 = vld [vmem:[%s2077_s0 + $0x38] sm:$0xff]  ;;  %v1105_v1 = vld [vmem:[%s2077_s0 + $0x30] sm:$0xff]  ;;  %v1110_v2 = vld [vmem:[%s2077_s0] sm:$0xff]  ;;  %997 = vset.pattern.permute.xlu2 %v1050_v45  ;;  %999 = vset.pattern.permute.xlu1 %v1050_v45 }
   0x2   :  { %v73_v3 = vmul.f32 %v1100_v0, %v1100_v0  ;;  %v72_v4 = vmul.f32 %v1105_v1, %v1105_v1  ;;  %v66_v5 = vmul.f32 %v1110_v2, %v1110_v2  ;;  %v1121_v6 = vld [vmem:[%s2077_s0 + $0x10] sm:$0xff]  ;;  %v1126_v7 = vld [vmem:[%s2077_s0 + $0x18] sm:$0xff]  ;;  %v1139_v12 = vld [vmem:[%s2077_s0 + $0x8] sm:$0xff]  ;;  %998 = vset.pattern.permute.xlu0 %v1050_v45 }
   0x3   :  { %v1131_v8 = vld [vmem:[%s2078_s7 + $0x78] sm:$0xff]  ;;  %v380_v13 = vld [vmem:[%s2078_s7 + $0x70] sm:$0xff]  ;;  %v379_v14 = vld [vmem:[%s2078_s7 + $0x68] sm:$0xff]  ;;  %v68_v15 = vmul.f32 %v1121_v6, %v1121_v6  ;;  %v69_v16 = vmul.f32 %v1126_v7, %v1126_v7  ;;  %v67_v17 = vmul.f32 %v1139_v12, %v1139_v12 }
   0x4   :  { %v96_v9 = vsel %vm74_vm0, %v73_v3, 0.0  ;;  %v93_v10 = vsel %vm74_vm0, %v72_v4, 0.0  ;;  %v75_v11 = vsel %vm74_vm0, %v66_v5, 0.0  ;;  %382 = vmatpush.msra.mxu1 %v1131_v8  ;;  %963 = vmatpush.msra.mxu2 %v1131_v8  ;;  %v378_v18 = vld [vmem:[%s2078_s7 + $0x60] sm:$0xff]  ;;  %v377_v19 = vld [vmem:[%s2078_s7 + $0x58] sm:$0xff]  ;;  %v1167_v23 = vld [vmem:[%s2077_s0 + $0x28] sm:$0xff] }
   0x5   :  { %97 = vadd.xlane.f32.xlu2 %v96_v9  ;;  %94 = vadd.xlane.f32.xlu1 %v93_v10  ;;  %v81_v20 = vsel %vm74_vm0, %v68_v15, 0.0  ;;  %v84_v21 = vsel %vm74_vm0, %v69_v16, 0.0  ;;  %v78_v22 = vsel %vm74_vm0, %v67_v17, 0.0  ;;  %v1172_v24 = vld [vmem:[%s2077_s0 + $0x20] sm:$0xff]  ;;  %v71_v25 = vmul.f32 %v1167_v23, %v1167_v23  ;;  %v198_v29 = vld [vmem:[%s2081_s4 + $0x18] sm:$0xff]  ;;  %v376_v30 = vld [vmem:[%s2078_s7 + $0x50] sm:$0xff] }
   0x6   :  { %76 = vadd.xlane.f32.xlu0 %v75_v11  ;;  %383 = vmatpush.msra.mxu1 %v380_v13  ;;  %v70_v26 = vmul.f32 %v1172_v24, %v1172_v24  ;;  %v197_v31 = vld [vmem:[%s2081_s4 + $0x10] sm:$0xff]  ;;  %v375_v32 = vld [vmem:[%s2078_s7 + $0x48] sm:$0xff]  ;;  %v374_v34 = vld [vmem:[%s2078_s7 + $0x40] sm:$0xff] }
   0x7   :  { %965 = vmatpush.msra.mxu2 %v380_v13  ;;  %v90_v27 = vsel %vm74_vm0, %v71_v25, 0.0  ;;  %959 = vmatpush.msra.mxu3 %v198_v29  ;;  %v196_v33 = vld [vmem:[%s2081_s4 + $0x8] sm:$0xff]  ;;  %v195_v35 = vld [vmem:[%s2081_s4] sm:$0xff]  ;;  %v373_v36 = vld [vmem:[%s2078_s7 + $0x38] sm:$0xff] }
   0x8   :  { %384 = vmatpush.msra.mxu1 %v379_v14  ;;  %v87_v28 = vsel %vm74_vm0, %v70_v26, 0.0  ;;  %235 = vmatpush.msra.mxu0 %v198_v29  ;;  %v372_v37 = vld [vmem:[%s2078_s7 + $0x30] sm:$0xff]  ;;  %v371_v38 = vld [vmem:[%s2078_s7 + $0x28] sm:$0xff]  ;;  %v370_v39 = vld [vmem:[%s2078_s7 + $0x20] sm:$0xff] }
   0x9   :  { %967 = vmatpush.msra.mxu2 %v379_v14  ;;  %960 = vmatpush.msra.mxu3 %v197_v31  ;;  %v369_v40 = vld [vmem:[%s2078_s7 + $0x18] sm:$0xff]  ;;  %v368_v41 = vld [vmem:[%s2078_s7 + $0x10] sm:$0xff]  ;;  %v367_v42 = vld [vmem:[%s2078_s7 + $0x8] sm:$0xff] }
   0xa   :  { %385 = vmatpush.msra.mxu1 %v378_v18  ;;  %236 = vmatpush.msra.mxu0 %v197_v31  ;;  %v366_v43 = vld [vmem:[%s2078_s7] sm:$0xff]  ;;  %v359_v53 = vld [vmem:[%s2082_s2 + $0x8] sm:$0xff]  ;;  %v274_v54 = vld [vmem:[%s2083_s1 + $0x10] sm:$0xff] }
   0xb   :  { %969 = vmatpush.msra.mxu2 %v378_v18  ;;  %961 = vmatpush.msra.mxu3 %v196_v33  ;;  %v358_v44 = vld [vmem:[%s2082_s2] sm:$0xff]  ;;  %v275_v55 = vld [vmem:[%s2083_s1 + $0x18] sm:$0xff]  ;;  %v360_v3 = vld [vmem:[%s2082_s2 + $0x10] sm:$0xff] }
   0xc   :  { %386 = vmatpush.msra.mxu1 %v377_v19  ;;  %237 = vmatpush.msra.mxu0 %v196_v33  ;;  %v272_v46 = vld [vmem:[%s2083_s1] sm:$0xff]  ;;  %v273_v4 = vld [vmem:[%s2083_s1 + $0x8] sm:$0xff]  ;;  %v361_v9 = vld [vmem:[%s2082_s2 + $0x18] sm:$0xff] }
   0xd   :  { %82 = vadd.xlane.f32.xlu1 %v81_v20  ;;  %85 = vadd.xlane.f32.xlu2 %v84_v21  ;;  %v277_v10 = vld [vmem:[%s2083_s1 + $0x28] sm:$0xff]  ;;  %v276_v15 = vld [vmem:[%s2083_s1 + $0x20] sm:$0xff] }
   0xe   :  { %79 = vadd.xlane.f32.xlu0 %v78_v22  ;;  %971 = vmatpush.msra.mxu2 %v377_v19  ;;  %v362_v29 = vld [vmem:[%s2082_s2 + $0x20] sm:$0xff] }
   0xf   :  { %387 = vmatpush.msra.mxu1 %v376_v30  ;;  %962 = vmatpush.msra.mxu3 %v195_v35 }
  0x10   :  { %973 = vmatpush.msra.mxu2 %v376_v30  ;;  %238 = vmatpush.msra.mxu0 %v195_v35  ;;  %v278_v35 = vld [vmem:[%s2083_s1 + $0x30] sm:$0xff] }
  0x11   :  { %388 = vmatpush.msra.mxu1 %v375_v32  ;;  %964 = vmatpush.msrb.mxu3 %v1131_v8 }
  0x12   :  { %975 = vmatpush.msra.mxu2 %v375_v32 }
  0x13   :  { %389 = vmatpush.msra.mxu1 %v374_v34  ;;  %966 = vmatpush.msrb.mxu3 %v380_v13 }
  0x14   :  { %977 = vmatpush.msra.mxu2 %v374_v34 }
  0x15   :  { %91 = vadd.xlane.f32.xlu1 %v90_v27  ;;  %390 = vmatpush.msra.mxu1 %v373_v36 }
  0x16   :  { %88 = vadd.xlane.f32.xlu0 %v87_v28  ;;  %979 = vmatpush.msra.mxu2 %v373_v36 }
  0x17   :  { %391 = vmatpush.msra.mxu1 %v372_v37  ;;  %968 = vmatpush.msrb.mxu3 %v379_v14 }
  0x18   :  { %981 = vmatpush.msra.mxu2 %v372_v37 }
  0x19   :  { %392 = vmatpush.msra.mxu1 %v371_v38  ;;  %970 = vmatpush.msrb.mxu3 %v378_v18 }
  0x1a   :  { %983 = vmatpush.msra.mxu2 %v371_v38 }
  0x1b   :  { %393 = vmatpush.msra.mxu1 %v370_v39  ;;  %972 = vmatpush.msrb.mxu3 %v377_v19 }
  0x1c   :  { %985 = vmatpush.msra.mxu2 %v370_v39 }
  0x1d   :  { %394 = vmatpush.msra.mxu1 %v369_v40  ;;  %974 = vmatpush.msrb.mxu3 %v376_v30  ;;  %v279_v30 = vld [vmem:[%s2083_s1 + $0x38] sm:$0xff] }
  0x1e   :  { %987 = vmatpush.msra.mxu2 %v369_v40 }
  0x1f   :  { %395 = vmatpush.msra.mxu1 %v368_v41  ;;  %976 = vmatpush.msrb.mxu3 %v375_v32 }
  0x20   :  { %989 = vmatpush.msra.mxu2 %v368_v41 }
  0x21   :  { %396 = vmatpush.msra.mxu1 %v367_v42  ;;  %978 = vmatpush.msrb.mxu3 %v374_v34 }
  0x22   :  { %991 = vmatpush.msra.mxu2 %v367_v42 }
  0x23   :  { %397 = vmatpush.msra.mxu1 %v366_v43  ;;  %980 = vmatpush.msrb.mxu3 %v373_v36 }
  0x24   :  { %993 = vmatpush.msra.mxu2 %v366_v43  ;;  %398 = vmatmul.f32.vlgmr.msra.gmra.mxu1 %v358_v44 }
  0x25   :  { %982 = vmatpush.msrb.mxu3 %v372_v37  ;;  %282 = vperm.xlu2 %997, %v272_v46  }
  0x26   :  { %407 = vmatmul.f32.vlgmr.msra.gmra.mxu2 %v361_v9 }
  0x27   :  { %984 = vmatpush.msrb.mxu3 %v371_v38 }
  0x29   :  { %986 = vmatpush.msrb.mxu3 %v370_v39 }
  0x2a   :  { %285 = vperm.xlu0 %998, %v273_v4  }
  0x2b   :  { %988 = vmatpush.msrb.mxu3 %v369_v40 }
  0x2c   :  { %401 = vmatmul.f32.gmra.mxu1 %v359_v53 }
  0x2d   :  { %990 = vmatpush.msrb.mxu3 %v368_v41  ;;  %291 = vperm.xlu2 %997, %v275_v55  }
  0x2e   :  { %288 = vperm.xlu1 %999, %v274_v54   ;;  %410 = vmatmul.f32.gmra.mxu2 %v362_v29 }
  0x2f   :  { %992 = vmatpush.msrb.mxu3 %v367_v42 }
  0x31   :  { %994 = vmatpush.msrb.mxu3 %v366_v43 }
  0x34   :  { %404 = vmatmul.f32.gmra.mxu1 %v360_v3 }
  0x35   :  { %294 = vperm.xlu2 %997, %v276_v15  }
  0x36   :  { %297 = vperm.xlu1 %999, %v277_v10  }
  0x3d   :  { %300 = vperm.xlu2 %997, %v278_v35  }
  0x3e   :  { %303 = vperm.xlu1 %999, %v279_v30  }
  0x78   :  { %v98_v47 = vpop.xlane.xlu2 %97  ;;  %v95_v48 = vpop.xlane.xlu1 %94 }
  0x79   :  { %v1232_v49 = vmax.f32 %v98_v47, 1e-16  ;;  %v105_v50 = vmax.f32 %v95_v48, 1e-16  ;;  %v77_v51 = vpop.xlane.xlu0 %76 }
  0x7a   :  { %v1234_v52 = vmax.f32 %v77_v51, 1e-16 }
  0x7b   :  { %1002 = vrsqrt.f32 %v1232_v49  ;;  %vm173_vm2 = vweird.f32 %v105_v50  ;;  %vm183_vm6 = vweird.f32 %v1232_v49 }
  0x7c   :  { %1004 = vrsqrt.f32 %v105_v50  ;;  %vm113_vm5 = vweird.f32 %v1234_v52 }
  0x7d   :  { %1006 = vrsqrt.f32 %v1234_v52 }
  0x80   :  { %v83_v56 = vpop.xlane.xlu1 %82  ;;  %v86_v60 = vpop.xlane.xlu2 %85 }
  0x81   :  { %v1247_v57 = vpop.eup %1002  ;;  %v1249_v58 = vmax.f32 %v83_v56, 1e-16  ;;  %v80_v59 = vpop.xlane.xlu0 %79  ;;  %v1271_v14 = vmax.f32 %v86_v60, 1e-16 }
  0x82   :  { %v1005_v61 = vpop.eup %1004  ;;  %v178_v62 = vmul.f32 %v1247_v57, %v1232_v49  ;;  %v1253_v63 = vmax.f32 %v80_v59, 1e-16  ;;  %vm184_vm8 = vweird.f32 %v1247_v57 }
  0x83   :  { %v1007_v5 = vpop.eup %1006  ;;  %v168_v8 = vmul.f32 %v1005_v61, %v105_v50  ;;  %1008 = vrsqrt.f32 %v1249_v58  ;;  %vm174_vm1 = vweird.f32 %v1005_v61  ;;  %vm185_vm10 = vmor %vm183_vm6, %vm184_vm8  ;;  %vm133_vm13 = vweird.f32 %v1249_v58 }
  0x84   :  { %v179_v11 = vmul.f32 %v1247_v57, %v178_v62  ;;  %v108_v13 = vmul.f32 %v1007_v5, %v1234_v52  ;;  %1010 = vrsqrt.f32 %v1253_v63  ;;  %vm114_vm3 = vweird.f32 %v1007_v5  ;;  %vm175_vm4 = vmor %vm173_vm2, %vm174_vm1 }
  0x85   :  { %v169_v16 = vmul.f32 %v1005_v61, %v168_v8  ;;  %1012 = vrsqrt.f32 %v1271_v14  ;;  %vm115_vm7 = vmor %vm113_vm5, %vm114_vm3  ;;  %vm123_vm11 = vweird.f32 %v1253_v63  ;;  %vm143_vm1 = vweird.f32 %v1271_v14 }
  0x86   :  { %v109_v17 = vmul.f32 %v1007_v5, %v108_v13  ;;  %v180_v18 = vmul.f32 0.5, %v179_v11  ;;  %v365_v13 = vld [vmem:[%s2082_s2 + $0x38] sm:$0xff] }
  0x87   :  { %v170_v19 = vmul.f32 0.5, %v169_v16 }
  0x88   :  { %v110_v20 = vmul.f32 0.5, %v109_v17  ;;  %v181_v31 = vsub.f32 1.5, %v180_v18  ;;  %v92_v50 = vpop.xlane.xlu1 %91 }
  0x89   :  { %v1277_v21 = vpop.eup %1008  ;;  %v171_v22 = vsub.f32 1.5, %v170_v19  ;;  %v89_v25 = vpop.xlane.xlu0 %88  ;;  %v104_v52 = vmax.f32 %v92_v50, 1e-16 }
  0x8a   :  { %v1011_v26 = vpop.eup %1010  ;;  %v111_v27 = vsub.f32 1.5, %v110_v20  ;;  %v128_v28 = vmul.f32 %v1277_v21, %v1249_v58  ;;  %v1289_v34 = vmax.f32 %v89_v25, 1e-16  ;;  %v182_v44 = vmul.f32 %v1247_v57, %v181_v31 }
  0x8b   :  { %v118_v32 = vmul.f32 %v1011_v26, %v1253_v63  ;;  %v172_v33 = vmul.f32 %v1005_v61, %v171_v22  ;;  %v1013_v40 = vpop.eup %1012  ;;  %vm124_vm9 = vweird.f32 %v1011_v26  ;;  %vm134_vm14 = vweird.f32 %v1277_v21  ;;  %v1340_v22 = vld [vmem:[%s2079_s5] ss:$0 sm:$0xff] }
  0x8c   :  { %v129_v36 = vmul.f32 %v1277_v21, %v128_v28  ;;  %v112_v38 = vmul.f32 %v1007_v5, %v111_v27  ;;  %1014 = vrsqrt.f32 %v1289_v34  ;;  %v138_v48 = vmul.f32 %v1013_v40, %v1271_v14  ;;  %vm125_vm12 = vmor %vm123_vm11, %vm124_vm9 }
  0x8d   :  { %v119_v37 = vmul.f32 %v1011_v26, %v118_v32  ;;  %v176_v39 = vsel %vm175_vm4, %v1005_v61, %v172_v33  ;;  %v186_v51 = vsel %vm185_vm10, %v1247_v57, %v182_v44  ;;  %1016 = vrsqrt.f32 %v104_v52  ;;  %vm135_vm15 = vmor %vm133_vm13, %vm134_vm14  ;;  %v1354_v32 = vld [vmem:[%s2080_s6] ss:$0 sm:$0xff] }
  0x8e   :  { %v193_v41 = vmul.f32 %v176_v39, %v1105_v1  ;;  %v116_v43 = vsel %vm115_vm7, %v1007_v5, %v112_v38  ;;  %v130_v46 = vmul.f32 0.5, %v129_v36  ;;  %v363_v1 = vld [vmem:[%s2082_s2 + $0x28] sm:$0xff]  ;;  %v139_v54 = vmul.f32 %v1013_v40, %v138_v48 }
  0x8f   :  { %v120_v42 = vmul.f32 0.5, %v119_v37  ;;  %v187_v45 = vmul.f32 %v116_v43, %v1110_v2  ;;  %413 = vmatmul.f32.gmra.mxu2 %v363_v1  ;;  %v194_v59 = vmul.f32 %v186_v51, %v1100_v0  ;;  %v364_v0 = vld [vmem:[%s2082_s2 + $0x30] sm:$0xff]  ;;  %vm144_vm2 = vweird.f32 %v1013_v40 }
  0x90   :  { %933 = vmatmul.msk.f32.vlgmr.msra.gmra.mxu3 %vm74_vm0, %v193_v41  ;;  %v131_v53 = vsub.f32 1.5, %v130_v46  ;;  %v140_v60 = vmul.f32 0.5, %v139_v54  ;;  %vm145_vm3 = vmor %vm143_vm1, %vm144_vm2  ;;  %vm153_vm4 = vweird.f32 %v1289_v34  ;;  %vm163_vm7 = vweird.f32 %v104_v52 }
  0x91   :  { %v121_v47 = vsub.f32 1.5, %v120_v42  ;;  %927 = vmatmul.msk.f32.vlgmr.msra.gmra.mxu0 %vm74_vm0, %v187_v45 }
  0x92   :  { %v1015_v56 = vpop.eup %1014  ;;  %v132_v61 = vmul.f32 %v1277_v21, %v131_v53  ;;  %v141_v62 = vsub.f32 1.5, %v140_v60 }
  0x93   :  { %v122_v2 = vmul.f32 %v1011_v26, %v121_v47  ;;  %v148_v57 = vmul.f32 %v1015_v56, %v1289_v34  ;;  %v1017_v58 = vpop.eup %1016  ;;  %vm154_vm5 = vweird.f32 %v1015_v56 }
  0x94   :  { %v158_v5 = vmul.f32 %v1017_v58, %v104_v52  ;;  %v142_v8 = vmul.f32 %v1013_v40, %v141_v62  ;;  %vm155_vm6 = vmor %vm153_vm4, %vm154_vm5  ;;  %vm164_vm8 = vweird.f32 %v1017_v58 }
  0x95   :  { %v126_v55 = vsel %vm125_vm12, %v1011_v26, %v122_v2  ;;  %v149_v63 = vmul.f32 %v1015_v56, %v148_v57  ;;  %vm165_vm9 = vmor %vm163_vm7, %vm164_vm8 }
  0x96   :  { %v188_v49 = vmul.f32 %v126_v55, %v1139_v12  ;;  %v136_v12 = vsel %vm135_vm15, %v1277_v21, %v132_v61  ;;  %v159_v10 = vmul.f32 %v1017_v58, %v158_v5  ;;  %v146_v11 = vsel %vm145_vm3, %v1013_v40, %v142_v8 }
  0x97   :  { %v189_v3 = vmul.f32 %v136_v12, %v1121_v6  ;;  %v150_v4 = vmul.f32 0.5, %v149_v63  ;;  %v190_v14 = vmul.f32 %v146_v11, %v1126_v7  ;;  %v283_v7 = vpop.permute.xlu2 %282 }
  0x98   :  { %934 = vmatmul.msk.f32.gmra.mxu3 %vm74_vm0, %v194_v59  ;;  %v160_v6 = vmul.f32 0.5, %v159_v10  ;;  %vm306_vm10 = vcmp.eq.s32.totalorder %v283_v7, %v1340_v22 }
  0x99   :  { %928 = vmatmul.msk.f32.gmra.mxu0 %vm74_vm0, %v188_v49  ;;  %v151_v9 = vsub.f32 1.5, %v150_v4 }
  0x9a   :  { %v161_v16 = vsub.f32 1.5, %v160_v6 }
  0x9b   :  { %v152_v15 = vmul.f32 %v1015_v56, %v151_v9 }
  0x9c   :  { %v162_v19 = vmul.f32 %v1017_v58, %v161_v16  ;;  %v286_v28 = vpop.permute.xlu0 %285 }
  0x9d   :  { %v156_v17 = vsel %vm155_vm6, %v1015_v56, %v152_v15 }
  0x9e   :  { %v191_v18 = vmul.f32 %v156_v17, %v1172_v24  ;;  %v166_v20 = vsel %vm165_vm9, %v1017_v58, %v162_v19  ;;  %v1051_v24 = vmov 0.0   ;;  %vm33_vm9 = vcmask 7168  }
  0x9f   :  { %v192_v21 = vmul.f32 %v166_v20, %v1167_v23  ;;  %v1342_v25 = vpop.permute.xlu2 %291  ;;  %v935_v27 = vsel %vm306_vm10, 1.0, %v1051_v24  ;;  %50 = vst.msk [vmem:[#allocation4] sm:$0xff] %vm33_vm9, %v1051_v24 }
  0xa0   :  { %416 = vmatmul.f32.vlgmr.msrb.gmra.mxu3 %v364_v0  ;;  %v342_v29 = vsub.f32 1.0, %v935_v27  ;;  %v289_v38 = vpop.permute.xlu1 %288  ;;  %v334_v41 = vmul.f32 %v1354_v32, %v935_v27  ;;  %vm309_vm1 = vcmp.eq.s32.totalorder %v1342_v25, %v1340_v22  ;;  %34 = vst.msk [vmem:[#allocation2] sm:$0xff] %vm33_vm9, %v1051_v24 }
  0xa1   :  { %929 = vmatmul.msk.f32.gmra.mxu0 %vm74_vm0, %v189_v3  ;;  %v399_v26 = vpop.f32.mrf.mxu1  ;;  %vm308_vm12 = vcmp.eq.s32.totalorder %v289_v38, %v1340_v22  ;;  %v938_v20 = vsel %vm309_vm1, 1.0, %v1051_v24  ;;  %35 = vst.msk [vmem:[#allocation2 + $0x8] sm:$0xff] %vm33_vm9, %v1051_v24 }
  0xa2   :  { %v1348_v23 = vadd.f32 0.4, %v399_v26  ;;  %v350_v36 = vmul.f32 %v1354_v32, %v342_v29  ;;  %v937_v52 = vsel %vm308_vm12, 1.0, %v1051_v24  ;;  %v337_v27 = vmul.f32 %v1354_v32, %v938_v20  ;;  %36 = vst.msk [vmem:[#allocation2 + $0x10] sm:$0xff] %vm33_vm9, %v1051_v24 }
  0xa3   :  { %v344_v61 = vsub.f32 1.0, %v937_v52  ;;  %37 = vst.msk [vmem:[#allocation2 + $0x18] sm:$0xff] %vm33_vm9, %v1051_v24 }
  0xa4   :  { %38 = vst.msk [vmem:[#allocation2 + $0x20] sm:$0xff] %vm33_vm9, %v1051_v24 }
  0xa5   :  { %v352_v9 = vmul.f32 %v1354_v32, %v344_v61  ;;  %39 = vst.msk [vmem:[#allocation2 + $0x28] sm:$0xff] %vm33_vm9, %v1051_v24 }
  0xa6   :  { %40 = vst.msk [vmem:[#allocation2 + $0x30] sm:$0xff] %vm33_vm9, %v1051_v24 }
  0xa7   :  { %v1346_v30 = vpop.permute.xlu2 %294  ;;  %41 = vst.msk [vmem:[#allocation2 + $0x38] sm:$0xff] %vm33_vm9, %v1051_v24 }
  0xa8   :  { %419 = vmatmul.f32.gmra.mxu3 %v365_v13  ;;  %v1386_v57 = vpop.permute.xlu1 %297  ;;  %v336_v13 = vmul.f32 %v1354_v32, %v937_v52  ;;  %vm310_vm4 = vcmp.eq.s32.totalorder %v1346_v30, %v1340_v22  ;;  %42 = vst.msk [vmem:[#allocation3] sm:$0xff] %vm33_vm9, %v1051_v24 }
  0xa9   :  { %930 = vmatmul.msk.f32.gmra.mxu0 %vm74_vm0, %v190_v14  ;;  %v402_v35 = vpop.f32.mrf.mxu1  ;;  %v408_v58 = vpop.f32.mrf.mxu2  ;;  %v939_v30 = vsel %vm310_vm4, 1.0, %v1051_v24  ;;  %vm311_vm7 = vcmp.eq.s32.totalorder %v1386_v57, %v1340_v22  ;;  %43 = vst.msk [vmem:[#allocation3 + $0x8] sm:$0xff] %vm33_vm9, %v1051_v24 }
  0xaa   :  { %v1368_v45 = vadd.f32 0.4, %v402_v35  ;;  %44 = vst.msk [vmem:[#allocation3 + $0x10] sm:$0xff] %vm33_vm9, %v1051_v24 }
  0xab   :  { %45 = vst.msk [vmem:[#allocation3 + $0x18] sm:$0xff] %vm33_vm9, %v1051_v24 }
  0xac   :  { %46 = vst.msk [vmem:[#allocation3 + $0x20] sm:$0xff] %vm33_vm9, %v1051_v24 }
  0xad   :  { %47 = vst.msk [vmem:[#allocation3 + $0x28] sm:$0xff] %vm33_vm9, %v1051_v24 }
  0xae   :  { %48 = vst.msk [vmem:[#allocation3 + $0x30] sm:$0xff] %vm33_vm9, %v1051_v24 }
  0xaf   :  { %v301_v48 = vpop.permute.xlu2 %300  ;;  %49 = vst.msk [vmem:[#allocation3 + $0x38] sm:$0xff] %vm33_vm9, %v1051_v24 }
  0xb0   :  { %vm312_vm14 = vcmp.eq.s32.totalorder %v301_v48, %v1340_v22  ;;  %v338_v48 = vmul.f32 %v1354_v32, %v939_v30  ;;  %51 = vst.msk [vmem:[#allocation4 + $0x8] sm:$0xff] %vm33_vm9, %v1051_v24 }
  0xb1   :  { %931 = vmatmul.msk.f32.gmra.mxu0 %vm74_vm0, %v191_v18  ;;  %v405_v55 = vpop.f32.mrf.mxu1  ;;  %v941_v12 = vsel %vm312_vm14, 1.0, %v1051_v24  ;;  %v304_v18 = vpop.permute.xlu1 %303  ;;  %52 = vst.msk [vmem:[#allocation4 + $0x10] sm:$0xff] %vm33_vm9, %v1051_v24 }
  0xb2   :  { %v1389_v62 = vadd.f32 0.4, %v405_v55  ;;  %v340_v5 = vmul.f32 %v1354_v32, %v941_v12  ;;  %v411_v26 = vpop.f32.mrf.mxu2  ;;  %vm313_vm3 = vcmp.eq.s32.totalorder %v304_v18, %v1340_v22  ;;  %53 = vst.msk [vmem:[#allocation4 + $0x18] sm:$0xff] %vm33_vm9, %v1051_v24 }
  0xb3   :  { %54 = vst.msk [vmem:[#allocation4 + $0x20] sm:$0xff] %vm33_vm9, %v1051_v24 }
  0xb4   :  { %55 = vst.msk [vmem:[#allocation4 + $0x28] sm:$0xff] %vm33_vm9, %v1051_v24 }
  0xb5   :  { %56 = vst.msk [vmem:[#allocation4 + $0x30] sm:$0xff] %vm33_vm9, %v1051_v24 }
  0xb6   :  { %57 = vst.msk [vmem:[#allocation4 + $0x38] sm:$0xff] %vm33_vm9, %v1051_v24 }
  0xb9   :  { %932 = vmatmul.msk.f32.gmra.mxu0 %vm74_vm0, %v192_v21  ;;  %vm307_vm0 = vcmp.eq.s32.totalorder %v286_v28, %v1340_v22  ;;  %v348_v21 = vsub.f32 1.0, %v941_v12  ;;  %v346_v12 = vsub.f32 1.0, %v939_v30 }
  0xba   :  { %v936_v34 = vsel %vm307_vm0, 1.0, %v1051_v24 }
  0xbb   :  { %v343_v42 = vsub.f32 1.0, %v936_v34  ;;  %v335_v56 = vmul.f32 %v1354_v32, %v936_v34  ;;  %v356_v35 = vmul.f32 %v1354_v32, %v348_v21 }
  0xbd   :  { %v351_v2 = vmul.f32 %v1354_v32, %v343_v42 }
 0x10e   :  { %v240_v31 = vpop.f32.mrf.mxu0 }
 0x10f   :  { %v1356_v33 = vsub.f32 1.0, %v240_v31  ;;  %v1419_v31 = vadd.f32 0.4, %v408_v58 }
 0x111   :  { %vm488_vm11 = vcmp.lt.f32.partialorder %v1356_v33, %v1348_v23  ;;  %v943_v37 = vadd.f32 -0.05, %v1356_v33 }
 0x112   :  { %v951_v40 = vsel %vm488_vm11, 1.0, %v1051_v24 }
 0x113   :  { %v258_v39 = vpop.f32.mrf.mxu3  ;;  %v1365_v43 = vmul.f32 %v951_v40, %v350_v36  ;;  %v439_v44 = vmax.f32 %v943_v37, 0.0  ;;  %v942_v37 = vsel %vm313_vm3, 1.0, %v1051_v24 }
 0x114   :  { %v1371_v50 = vsub.f32 1.0, %v258_v39 }
 0x115   :  { %584 = vadd.xlane.f32.xlu2 %v1365_v43  ;;  %v447_v46 = vmul.f32 %v439_v44, %v334_v41  ;;  %v345_v41 = vsub.f32 1.0, %v938_v20  ;;  %v349_v44 = vsub.f32 1.0, %v942_v37 }
 0x116   :  { %v243_v47 = vpop.f32.mrf.mxu0  ;;  %v949_v60 = vadd.f32 -0.05, %v1371_v50 }
 0x117   :  { %v1373_v1 = vsub.f32 1.0, %v243_v47  ;;  %455 = vadd.xlane.f32.xlu0 %v447_v46  ;;  %v357_v55 = vmul.f32 %v1354_v32, %v349_v44 }
 0x118   :  { %v445_v4 = vmax.f32 %v949_v60, 0.0 }
 0x119   :  { %vm489_vm13 = vcmp.lt.f32.partialorder %v1373_v1, %v1368_v45  ;;  %v944_v51 = vadd.f32 -0.05, %v1373_v1 }
 0x11a   :  { %v952_v54 = vsel %vm489_vm13, 1.0, %v1051_v24  ;;  %v453_v6 = vmul.f32 %v445_v4, %v340_v5  ;;  %v528_v5 = vsub.f32 %v1348_v23, %v1356_v33  ;;  %v341_v33 = vmul.f32 %v1354_v32, %v942_v37 }
 0x11b   :  { %v261_v53 = vpop.f32.mrf.mxu3  ;;  %v1383_v49 = vmul.f32 %v952_v54, %v351_v2  ;;  %v440_v59 = vmax.f32 %v944_v51, 0.0  ;;  %v414_v2 = vpop.f32.mrf.mxu2  ;;  %v353_v54 = vmul.f32 %v1354_v32, %v345_v41  ;;  %v629_v41 = vld [vmem:[%s2084_s3 + $0x10] sm:$0xff] }
 0x11c   :  { %v1425_v38 = vsub.f32 1.0, %v261_v53  ;;  %v1443_v53 = vadd.f32 0.4, %v411_v26  ;;  %v1448_v60 = vadd.f32 0.4, %v414_v2  ;;  %v631_v2 = vld [vmem:[%s2084_s3 + $0x20] sm:$0xff] }
 0x11d   :  { %586 = vadd.xlane.f32.xlu1 %v1383_v49  ;;  %v448_v63 = vmul.f32 %v440_v59, %v335_v56  ;;  %v940_v59 = vsel %vm311_vm7, 1.0, %v1051_v24 }
 0x11e   :  { %v246_v0 = vpop.f32.mrf.mxu0  ;;  %v347_v58 = vsub.f32 1.0, %v940_v59  ;;  %v950_v23 = vadd.f32 -0.05, %v1425_v38 }
 0x11f   :  { %v1392_v3 = vsub.f32 1.0, %v246_v0  ;;  %457 = vadd.xlane.f32.xlu2 %v448_v63 }
 0x121   :  { %v945_v8 = vadd.f32 -0.05, %v1392_v3  ;;  %vm490_vm15 = vcmp.lt.f32.partialorder %v1392_v3, %v1389_v62 }
 0x122   :  { %v953_v11 = vsel %vm490_vm15, 1.0, %v1051_v24 }
 0x123   :  { %v417_v10 = vpop.f32.mrf.mxu3  ;;  %v441_v15 = vmax.f32 %v945_v8, 0.0  ;;  %v1405_v17 = vmul.f32 %v953_v11, %v352_v9  ;;  %v354_v8 = vmul.f32 %v1354_v32, %v346_v12  ;;  %v536_v11 = vmul.f32 %v528_v5, %v1365_v43 }
 0x124   :  { %v1401_v14 = vadd.f32 0.4, %v417_v10  ;;  %v355_v10 = vmul.f32 %v1354_v32, %v347_v58  ;;  %v446_v43 = vmax.f32 %v950_v23, 0.0 }
 0x125   :  { %467 = vadd.xlane.f32.xlu1 %v453_v6  ;;  %v449_v16 = vmul.f32 %v441_v15, %v336_v13 }
 0x126   :  { %v249_v19 = vpop.f32.mrf.mxu0  ;;  %vm494_vm2 = vcmp.lt.f32.partialorder %v1371_v50, %v1401_v14  ;;  %v454_v21 = vmul.f32 %v446_v43, %v341_v33 }
 0x127   :  { %v1410_v7 = vsub.f32 1.0, %v249_v19  ;;  %459 = vadd.xlane.f32.xlu0 %v449_v16  ;;  %588 = vadd.xlane.f32.xlu2 %v1405_v17  ;;  %v957_v29 = vsel %vm494_vm2, 1.0, %v1051_v24  ;;  %v529_v16 = vsub.f32 %v1368_v45, %v1373_v1  ;;  %v339_v1 = vmul.f32 %v1354_v32, %v940_v59 }
 0x128   :  { %v1427_v39 = vmul.f32 %v957_v29, %v356_v35  ;;  %v534_v32 = vsub.f32 %v1401_v14, %v1371_v50  ;;  %v628_v50 = vld [vmem:[%s2084_s3 + $0x8] sm:$0xff]  ;;  %v1576_v59 = vadd.f32 1e-05, %v631_v2 }
 0x129   :  { %v946_v25 = vadd.f32 -0.05, %v1410_v7  ;;  %vm491_vm5 = vcmp.lt.f32.partialorder %v1410_v7, %v1419_v31  ;;  %v531_v15 = vsub.f32 %v1419_v31, %v1410_v7  ;;  %v537_v19 = vmul.f32 %v529_v16, %v1383_v49 }
 0x12a   :  { %v954_v51 = vsel %vm491_vm5, 1.0, %v1051_v24  ;;  %v530_v7 = vsub.f32 %v1389_v62, %v1392_v3  ;;  %v1545_v14 = vadd.f32 1e-05, %v628_v50 }
 0x12b   :  { %v420_v28 = vpop.f32.mrf.mxu3  ;;  %v442_v36 = vmax.f32 %v946_v25, 0.0  ;;  %v515_v22 = vmul.f32 %v954_v51, %v353_v54  ;;  %v424_v54 = vld [vmem:[#allocation2 + $0x8] sm:$0xff] }
 0x12c   :  { %v1421_v34 = vadd.f32 0.4, %v420_v28  ;;  %vm662_vm13 = vweird.f32 %v1545_v14  ;;  %v666_v50 = vand.u32 2147483647, %v1545_v14 }
 0x12d   :  { %v450_v40 = vmul.f32 %v442_v36, %v337_v27  ;;  %v539_v18 = vmul.f32 %v531_v15, %v515_v22  ;;  %v538_v27 = vmul.f32 %v530_v7, %v1405_v17  ;;  %v542_v17 = vmul.f32 %v534_v32, %v1427_v39  ;;  %v423_v36 = vld [vmem:[#allocation2] sm:$0xff] }
 0x12e   :  { %v252_v42 = vpop.f32.mrf.mxu0  ;;  %vm495_vm6 = vcmp.lt.f32.partialorder %v1425_v38, %v1421_v34  ;;  %v535_v62 = vsub.f32 %v1421_v34, %v1425_v38  ;;  %v576_v34 = vld [vmem:[#allocation4] sm:$0xff]  ;;  %v668_v32 = vand.u32 2147483648, %v1545_v14  ;;  %vm1655_vm2 = vcmp.eq.f32.partialorder %v666_v50, 8.507059e+37 }
 0x12f   :  { %v1434_v46 = vsub.f32 1.0, %v252_v42  ;;  %596 = vadd.xlane.f32.xlu0 %v1427_v39  ;;  %461 = vadd.xlane.f32.xlu1 %v450_v40  ;;  %v958_v52 = vsel %vm495_vm6, 1.0, %v1051_v24  ;;  %v633_v39 = vld [vmem:[%s2084_s3 + $0x30] sm:$0xff] }
 0x130   :  { %v1450_v57 = vmul.f32 %v958_v52, %v357_v55  ;;  %v1559_v44 = vadd.f32 1e-05, %v633_v39 }
 0x131   :  { %v947_v47 = vadd.f32 -0.05, %v1434_v46  ;;  %vm492_vm8 = vcmp.lt.f32.partialorder %v1434_v46, %v1443_v53  ;;  %v532_v49 = vsub.f32 %v1443_v53, %v1434_v46  ;;  %v1562_v46 = vadd.f32 1e-05, %v629_v41 }
 0x132   :  { %v955_v4 = vsel %vm492_vm8, 1.0, %v1051_v24  ;;  %v543_v28 = vmul.f32 %v535_v62, %v1450_v57  ;;  %v738_v2 = vand.u32 2147483648, %v1559_v44  ;;  %vm732_vm3 = vweird.f32 %v1559_v44 }
 0x133   :  { %v443_v56 = vmax.f32 %v947_v47, 0.0  ;;  %v516_v13 = vmul.f32 %v955_v4, %v354_v8  ;;  %v630_v47 = vld [vmem:[%s2084_s3 + $0x18] sm:$0xff]  ;;  %vm676_vm5 = vweird.f32 %v1562_v46 }
 0x134   :  { %v1573_v55 = vadd.f32 1e-05, %v630_v47 }
 0x135   :  { %v451_v61 = vmul.f32 %v443_v56, %v338_v48  ;;  %v540_v25 = vmul.f32 %v532_v49, %v516_v13  ;;  %v577_v48 = vld [vmem:[#allocation4 + $0x8] sm:$0xff] }
 0x136   :  { %v255_v63 = vpop.f32.mrf.mxu0  ;;  %vm690_vm8 = vweird.f32 %v1573_v55 }
 0x137   :  { %v1454_v0 = vsub.f32 1.0, %v255_v63  ;;  %590 = vadd.xlane.f32.xlu0 %v515_v22  ;;  %598 = vadd.xlane.f32.xlu1 %v1450_v57 }
 0x138   :  { %463 = vadd.xlane.f32.xlu2 %v451_v61 }
 0x139   :  { %vm493_vm10 = vcmp.lt.f32.partialorder %v1454_v0, %v1448_v60  ;;  %v948_v20 = vadd.f32 -0.05, %v1454_v0  ;;  %v533_v3 = vsub.f32 %v1448_v60, %v1454_v0  ;;  %v429_v0 = vld [vmem:[#allocation2 + $0x30] sm:$0xff] }
 0x13a   :  { %v956_v9 = vsel %vm493_vm10, 1.0, %v1051_v24  ;;  %v627_v24 = vld [vmem:[%s2084_s3] sm:$0xff] }
 0x13b   :  { %v517_v6 = vmul.f32 %v956_v9, %v355_v10  ;;  %v444_v45 = vmax.f32 %v948_v20, 0.0  ;;  %v1539_v31 = vadd.f32 1e-05, %v627_v24  ;;  %v578_v10 = vld [vmem:[#allocation4 + $0x10] sm:$0xff] }
 0x13d   :  { %v452_v26 = vmul.f32 %v444_v45, %v339_v1  ;;  %v541_v29 = vmul.f32 %v533_v3, %v517_v6  ;;  %1018 = vrcp.f32 %v1539_v31  ;;  %vm648_vm0 = vweird.f32 %v1539_v31 }
 0x13e   :  { %1020 = vrcp.f32 %v1545_v14  ;;  %v654_v8 = vand.u32 2147483648, %v1539_v31  ;;  %v652_v23 = vand.u32 2147483647, %v1539_v31 }
 0x13f   :  { %544 = vadd.xlane.f32.xlu0 %v536_v11  ;;  %592 = vadd.xlane.f32.xlu1 %v516_v13  ;;  %1022 = vrcp.f32 %v1559_v44  ;;  %v425_v11 = vld [vmem:[#allocation2 + $0x10] sm:$0xff]  ;;  %v634_v13 = vld [vmem:[%s2084_s3 + $0x38] sm:$0xff] }
 0x140   :  { %594 = vadd.xlane.f32.xlu2 %v517_v6  ;;  %1024 = vrcp.f32 %v1562_v46  ;;  %v1613_v7 = vadd.f32 1e-05, %v634_v13  ;;  %vm1620_vm15 = vcmp.eq.f32.partialorder %v652_v23, 8.507059e+37  ;;  %v583_v13 = vld [vmem:[#allocation4 + $0x38] sm:$0xff] }
 0x141   :  { %1026 = vrcp.f32 %v1573_v55  ;;  %v579_v6 = vld [vmem:[#allocation4 + $0x18] sm:$0xff] }
 0x142   :  { %1028 = vrcp.f32 %v1576_v59 }
 0x143   :  { %v1547_v37 = vpop.eup %1018 }
 0x144   :  { %v644_v42 = vmul.f32 %v1547_v37, %v1539_v31  ;;  %v1570_v51 = vpop.eup %1020  ;;  %vm649_vm11 = vweird.f32 %v1547_v37 }
 0x145   :  { %v658_v60 = vmul.f32 %v1570_v51, %v1545_v14  ;;  %v1585_v63 = vpop.eup %1022  ;;  %vm1596_vm12 = vmor %vm648_vm0, %vm649_vm11  ;;  %vm663_vm14 = vweird.f32 %v1570_v51  ;;  %vm704_vm0 = vweird.f32 %v1576_v59 }
 0x146   :  { %v645_v52 = vsub.f32 1.0, %v644_v42  ;;  %v1589_v58 = vpop.eup %1024  ;;  %v728_v33 = vmul.f32 %v1585_v63, %v1559_v44  ;;  %vm1635_vm1 = vmor %vm662_vm13, %vm663_vm14  ;;  %vm733_vm4 = vweird.f32 %v1585_v63 }
 0x147   :  { %550 = vadd.xlane.f32.xlu0 %v539_v18  ;;  %546 = vadd.xlane.f32.xlu1 %v537_v19  ;;  %v659_v12 = vsub.f32 1.0, %v658_v60  ;;  %v1603_v15 = vpop.eup %1026  ;;  %v672_v20 = vmul.f32 %v1589_v58, %v1562_v46  ;;  %vm677_vm6 = vweird.f32 %v1589_v58 }
 0x148   :  { %469 = vadd.xlane.f32.xlu2 %v454_v21  ;;  %v646_v61 = vmul.f32 %v1547_v37, %v645_v52  ;;  %v1610_v45 = vpop.eup %1028  ;;  %v729_v62 = vsub.f32 1.0, %v728_v33  ;;  %v686_v3 = vmul.f32 %v1603_v15, %v1573_v55  ;;  %vm1688_vm7 = vmor %vm676_vm5, %vm677_vm6  ;;  %vm691_vm10 = vweird.f32 %v1603_v15 }
 0x149   :  { %v660_v18 = vmul.f32 %v1570_v51, %v659_v12  ;;  %vm705_vm11 = vweird.f32 %v1610_v45  ;;  %vm746_vm5 = vweird.f32 %v1613_v7 }
 0x14a   :  { %v647_v5 = vadd.f32 %v1547_v37, %v646_v61  ;;  %v687_v39 = vsub.f32 1.0, %v686_v3  ;;  %v682_v61 = vand.u32 2147483648, %v1562_v46  ;;  %vm1726_vm14 = vmor %vm704_vm0, %vm705_vm11 }
 0x14c   :  { %v688_v12 = vmul.f32 %v1603_v15, %v687_v39 }
 0x14e   :  { %v689_v33 = vadd.f32 %v1603_v15, %v688_v12 }
 0x14f   :  { %465 = vadd.xlane.f32.xlu0 %v452_v26  ;;  %552 = vadd.xlane.f32.xlu1 %v540_v25  ;;  %v651_v26 = vsel %vm1596_vm12, %v1547_v37, %v647_v5  ;;  %v655_v25 = vor.u32 1.1754944e-38, %v654_v8  ;;  %v1645_v37 = vor.u32 1.1754944e-38, %v668_v32  ;;  %v680_v5 = vand.u32 2147483647, %v1562_v46  ;;  %vm1712_vm12 = vmor %vm690_vm8, %vm691_vm10 }
 0x150   :  { %548 = vadd.xlane.f32.xlu2 %v538_v27  ;;  %v693_v39 = vsel %vm1712_vm12, %v1603_v15, %v689_v33 }
 0x151   :  { %vm1718_vm13 = vcmp.eq.f32.partialorder %v680_v5, 8.507059e+37 }
 0x157   :  { %556 = vadd.xlane.f32.xlu0 %v542_v17  ;;  %558 = vadd.xlane.f32.xlu1 %v543_v28  ;;  %v1630_v17 = vadd.f32 %v1570_v51, %v660_v18  ;;  %v673_v28 = vsub.f32 1.0, %v672_v20  ;;  %v427_v18 = vld [vmem:[#allocation2 + $0x20] sm:$0xff] }
 0x158   :  { %554 = vadd.xlane.f32.xlu2 %v541_v29  ;;  %v700_v29 = vmul.f32 %v1610_v45, %v1576_v59 }
 0x159   :  { %v665_v14 = vsel %vm1635_vm1, %v1570_v51, %v1630_v17  ;;  %v674_v41 = vmul.f32 %v1589_v58, %v673_v28 }
 0x15a   :  { %v701_v47 = vsub.f32 1.0, %v700_v29 }
 0x15c   :  { %v702_v8 = vmul.f32 %v1610_v45, %v701_v47 }
 0x188   :  { %v585_v35 = vpop.xlane.xlu2 %584 }
 0x189   :  { %v600_v38 = vadd.f32 %v585_v35, %v576_v34  ;;  %v426_v34 = vld [vmem:[#allocation2 + $0x18] sm:$0xff]  ;;  %v582_v35 = vld [vmem:[#allocation4 + $0x30] sm:$0xff] }
 0x18a   :  { %v456_v40 = vpop.xlane.xlu0 %455 }
 0x18b   :  { %608 = vst.msk [vmem:[#allocation4] sm:$0xff] %vm33_vm9, %v600_v38  ;;  %v471_v30 = vadd.f32 %v456_v40, %v423_v36  ;;  %v1643_v36 = vsel %vm1620_vm15, %v655_v25, %v651_v26  ;;  %v730_v38 = vmul.f32 %v1585_v63, %v729_v62  ;;  %v703_v26 = vadd.f32 %v1610_v45, %v702_v8  ;;  %vm1736_vm15 = vmor %vm732_vm3, %vm733_vm4 }
 0x18c   :  { %v708_v25 = vand.u32 2147483647, %v1576_v59 }
 0x18d   :  { %480 = vst.msk [vmem:[#allocation2] sm:$0xff] %vm33_vm9, %v471_v30  ;;  %v707_v51 = vsel %vm1726_vm14, %v1610_v45, %v703_v26 }
 0x18e   :  { %vm709_vm1 = vcmp.eq.f32.partialorder %v708_v25, 8.507059e+37  ;;  %v750_v25 = vand.u32 2147483647, %v1613_v7 }
 0x190   :  { %v587_v53 = vpop.xlane.xlu1 %586  ;;  %vm751_vm12 = vcmp.eq.f32.partialorder %v750_v25, 8.507059e+37 }
 0x191   :  { %v601_v56 = vadd.f32 %v587_v53, %v577_v48  ;;  %v580_v48 = vld [vmem:[#allocation4 + $0x20] sm:$0xff] }
 0x192   :  { %v458_v22 = vpop.xlane.xlu2 %457  ;;  %v771_v4 = vld [vmem:[#allocation4] sm:$0xff] }
 0x193   :  { %609 = vst.msk [vmem:[#allocation4 + $0x8] sm:$0xff] %vm33_vm9, %v601_v56  ;;  %v472_v57 = vadd.f32 %v458_v22, %v424_v54  ;;  %v1605_v16 = vadd.f32 1e-05, %v771_v4  ;;  %v1669_v22 = vadd.f32 %v1585_v63, %v730_v38  ;;  %v675_v4 = vadd.f32 %v1589_v58, %v674_v41 }
 0x194   :  { %v670_v38 = vsel %vm1655_vm2, %v1645_v37, %v665_v14 }
 0x195   :  { %481 = vst.msk [vmem:[#allocation2 + $0x8] sm:$0xff] %vm33_vm9, %v472_v57  ;;  %1030 = vrcp.f32 %v1605_v16  ;;  %v679_v20 = vsel %vm1688_vm7, %v1589_v58, %v675_v4  ;;  %v735_v31 = vsel %vm1736_vm15, %v1585_v63, %v1669_v22  ;;  %vm792_vm2 = vweird.f32 %v1605_v16 }
 0x196   :  { %1032 = vrcp.f32 %v1613_v7  ;;  %v798_v12 = vand.u32 2147483648, %v1605_v16 }
 0x198   :  { %v468_v9 = vpop.xlane.xlu1 %467 }
 0x199   :  { %v477_v43 = vadd.f32 %v468_v9, %v429_v0  ;;  %v632_v0 = vld [vmem:[%s2084_s3 + $0x28] sm:$0xff] }
 0x19a   :  { %v589_v19 = vpop.xlane.xlu2 %588  ;;  %v460_v21 = vpop.xlane.xlu0 %459  ;;  %v772_v24 = vld [vmem:[#allocation4 + $0x8] sm:$0xff]  ;;  %v1699_v46 = vadd.f32 1e-05, %v632_v0 }
 0x19b   :  { %486 = vst.msk [vmem:[#allocation2 + $0x30] sm:$0xff] %vm33_vm9, %v477_v43  ;;  %v602_v1 = vadd.f32 %v589_v19, %v578_v10  ;;  %v473_v49 = vadd.f32 %v460_v21, %v425_v11  ;;  %v1648_v40 = vadd.f32 1e-05, %v772_v24  ;;  %v1660_v54 = vpop.eup %1030  ;;  %v696_v11 = vand.u32 2147483648, %v1573_v55 }
 0x19c   :  { %v1666_v60 = vpop.eup %1032  ;;  %v788_v9 = vmul.f32 %v1660_v54, %v1605_v16  ;;  %v694_v43 = vand.u32 2147483647, %v1573_v55  ;;  %v710_v19 = vand.u32 2147483648, %v1576_v59  ;;  %v683_v21 = vor.u32 1.1754944e-38, %v682_v61 }
 0x19d   :  { %610 = vst.msk [vmem:[#allocation4 + $0x10] sm:$0xff] %vm33_vm9, %v602_v1  ;;  %1034 = vrcp.f32 %v1648_v40  ;;  %v742_v23 = vmul.f32 %v1666_v60, %v1613_v7  ;;  %v697_v50 = vor.u32 1.1754944e-38, %v696_v11  ;;  %vm793_vm4 = vweird.f32 %v1660_v54 }
 0x19e   :  { %482 = vst.msk [vmem:[#allocation2 + $0x10] sm:$0xff] %vm33_vm9, %v473_v49  ;;  %v789_v28 = vsub.f32 1.0, %v788_v9  ;;  %vm695_vm3 = vcmp.eq.f32.partialorder %v694_v43, 8.507059e+37  ;;  %v711_v41 = vor.u32 1.1754944e-38, %v710_v19  ;;  %v1770_v37 = vsel %vm1718_vm13, %v683_v21, %v679_v20  ;;  %v620_v9 = vld [vmem:[#allocation2 + $0x8] sm:$0xff]  ;;  %vm1824_vm10 = vmor %vm792_vm2, %vm793_vm4 }
 0x19f   :  { %v743_v59 = vsub.f32 1.0, %v742_v23  ;;  %v1777_v47 = vsel %vm695_vm3, %v697_v50, %v693_v39  ;;  %v796_v61 = vand.u32 2147483647, %v1605_v16  ;;  %v810_v8 = vand.u32 2147483647, %v1648_v40  ;;  %v521_v16 = vld [vmem:[#allocation3 + $0x8] sm:$0xff] }
 0x1a0   :  { %v790_v45 = vmul.f32 %v1660_v54, %v789_v28  ;;  %vm747_vm6 = vweird.f32 %v1666_v60  ;;  %v812_v19 = vand.u32 2147483648, %v1648_v40  ;;  %v752_v21 = vand.u32 2147483648, %v1613_v7 }
 0x1a1   :  { %vm1800_vm7 = vcmp.eq.f32.partialorder %v796_v61, 8.507059e+37  ;;  %vm1808_vm8 = vmor %vm746_vm5, %vm747_vm6  ;;  %v1815_v32 = vmul.f32 %v670_v38, %v620_v9  ;;  %vm806_vm0 = vweird.f32 %v1648_v40  ;;  %vm1843_vm11 = vcmp.eq.f32.partialorder %v810_v8, 8.507059e+37 }
 0x1a2   :  { %v462_v30 = vpop.xlane.xlu1 %461  ;;  %v597_v42 = vpop.xlane.xlu0 %596  ;;  %v753_v39 = vor.u32 1.1754944e-38, %v752_v21  ;;  %vm718_vm4 = vweird.f32 %v1699_v46 }
 0x1a3   :  { %v474_v52 = vadd.f32 %v462_v30, %v426_v34  ;;  %v606_v53 = vadd.f32 %v597_v42, %v582_v35  ;;  %v1730_v29 = vpop.eup %1034  ;;  %v619_v35 = vld [vmem:[#allocation2] sm:$0xff]  ;;  %v736_v30 = vand.u32 2147483647, %v1559_v44  ;;  %v1754_v42 = vor.u32 1.1754944e-38, %v738_v2 }
 0x1a4   :  { %v773_v56 = vld [vmem:[#allocation4 + $0x10] sm:$0xff]  ;;  %v802_v15 = vmul.f32 %v1730_v29, %v1648_v40  ;;  %v1775_v14 = vmul.f32 %v1643_v36, %v619_v35  ;;  %v520_v2 = vld [vmem:[#allocation3] sm:$0xff]  ;;  %v1837_v35 = vor.u32 1.1754944e-38, %v812_v19  ;;  %vm807_vm13 = vweird.f32 %v1730_v29 }
 0x1a5   :  { %v1671_v57 = vadd.f32 1e-05, %v773_v56  ;;  %483 = vst.msk [vmem:[#allocation2 + $0x18] sm:$0xff] %vm33_vm9, %v474_v52  ;;  %v744_v52 = vmul.f32 %v1666_v60, %v743_v59  ;;  %v581_v56 = vld [vmem:[#allocation4 + $0x28] sm:$0xff]  ;;  %v621_v59 = vld [vmem:[#allocation2 + $0x10] sm:$0xff] }
 0x1a6   :  { %614 = vst.msk [vmem:[#allocation4 + $0x30] sm:$0xff] %vm33_vm9, %v606_v53  ;;  %v1781_v53 = vsel %vm709_vm1, %v711_v41, %v707_v51  ;;  %v803_v33 = vsub.f32 1.0, %v802_v15  ;;  %v523_v41 = vld [vmem:[#allocation3 + $0x18] sm:$0xff]  ;;  %vm1878_vm1 = vmor %vm806_vm0, %vm807_vm13 }
 0x1a7   :  { %1036 = vrcp.f32 %v1671_v57  ;;  %v745_v20 = vadd.f32 %v1666_v60, %v744_v52  ;;  %v430_v51 = vld [vmem:[#allocation2 + $0x38] sm:$0xff]  ;;  %v824_v15 = vand.u32 2147483647, %v1671_v57  ;;  %vm820_vm14 = vweird.f32 %v1671_v57 }
 0x1a8   :  { %1038 = vrcp.f32 %v1699_v46 }
 0x1a9   :  { %v749_v38 = vsel %vm1808_vm8, %v1666_v60, %v745_v20  ;;  %vm1864_vm3 = vcmp.eq.f32.partialorder %v824_v15, 8.507059e+37 }
 0x1aa   :  { %v599_v49 = vpop.xlane.xlu1 %598  ;;  %v591_v27 = vpop.xlane.xlu0 %590  ;;  %v1857_v8 = vsel %vm751_vm12, %v753_v39, %v749_v38 }
 0x1ab   :  { %v607_v58 = vadd.f32 %v599_v49, %v583_v13  ;;  %v464_v62 = vpop.xlane.xlu2 %463  ;;  %v603_v3 = vadd.f32 %v591_v27, %v579_v6  ;;  %v791_v6 = vadd.f32 %v1660_v54, %v790_v45 }
 0x1ac   :  { %v475_v34 = vadd.f32 %v464_v62, %v427_v18 }
 0x1ad   :  { %615 = vst.msk [vmem:[#allocation4 + $0x38] sm:$0xff] %vm33_vm9, %v607_v58  ;;  %v1760_v17 = vpop.eup %1036  ;;  %v777_v10 = vld [vmem:[#allocation4 + $0x30] sm:$0xff]  ;;  %v795_v50 = vsel %vm1824_vm10, %v1660_v54, %v791_v6 }
 0x1ae   :  { %484 = vst.msk [vmem:[#allocation2 + $0x20] sm:$0xff] %vm33_vm9, %v475_v34  ;;  %v1786_v0 = vpop.eup %1038  ;;  %v816_v36 = vmul.f32 %v1760_v17, %v1671_v57  ;;  %v1817_v58 = vadd.f32 1e-05, %v777_v10  ;;  %v804_v34 = vmul.f32 %v1730_v29, %v803_v33  ;;  %v826_v10 = vand.u32 2147483648, %v1671_v57 }
 0x1af   :  { %611 = vst.msk [vmem:[#allocation4 + $0x18] sm:$0xff] %vm33_vm9, %v603_v3  ;;  %v714_v27 = vmul.f32 %v1786_v0, %v1699_v46  ;;  %v799_v3 = vor.u32 1.1754944e-38, %v798_v12  ;;  %vm821_vm2 = vweird.f32 %v1760_v17  ;;  %vm719_vm5 = vweird.f32 %v1786_v0 }
 0x1b0   :  { %v817_v7 = vsub.f32 1.0, %v816_v36  ;;  %v805_v61 = vadd.f32 %v1730_v29, %v804_v34  ;;  %v827_v62 = vor.u32 1.1754944e-38, %v826_v10  ;;  %vm1910_vm6 = vmor %vm820_vm14, %vm821_vm2 }
 0x1b1   :  { %v715_v45 = vsub.f32 1.0, %v714_v27 }
 0x1b2   :  { %v593_v4 = vpop.xlane.xlu1 %592  ;;  %v545_v5 = vpop.xlane.xlu0 %544  ;;  %v818_v52 = vmul.f32 %v1760_v17, %v817_v7  ;;  %v809_v40 = vsel %vm1878_vm1, %v1730_v29, %v805_v61  ;;  %v722_v7 = vand.u32 2147483647, %v1699_v46 }
 0x1b3   :  { %v604_v11 = vadd.f32 %v593_v4, %v580_v48  ;;  %v595_v13 = vpop.xlane.xlu2 %594  ;;  %v560_v23 = vadd.f32 %v545_v5, %v520_v2  ;;  %v800_v48 = vsel %vm1800_vm7, %v799_v3, %v795_v50  ;;  %v716_v6 = vmul.f32 %v1786_v0, %v715_v45  ;;  %v428_v3 = vld [vmem:[#allocation2 + $0x28] sm:$0xff]  ;;  %vm1927_vm7 = vmor %vm718_vm4, %vm719_vm5 }
 0x1b4   :  { %v778_v43 = vld [vmem:[#allocation4 + $0x38] sm:$0xff]  ;;  %v605_v18 = vadd.f32 %v595_v13, %v581_v56  ;;  %v1854_v56 = vmul.f32 %v1770_v37, %v621_v59  ;;  %v819_v21 = vadd.f32 %v1760_v17, %v818_v52  ;;  %v522_v59 = vld [vmem:[#allocation3 + $0x10] sm:$0xff]  ;;  %vm1978_vm14 = vcmp.eq.f32.partialorder %v722_v7, 8.507059e+37 }
 0x1b5   :  { %v1797_v1 = vadd.f32 1e-05, %v778_v43  ;;  %612 = vst.msk [vmem:[#allocation4 + $0x20] sm:$0xff] %vm33_vm9, %v604_v11  ;;  %v622_v43 = vld [vmem:[#allocation2 + $0x18] sm:$0xff]  ;;  %v1915_v38 = vadd.f32 %v1786_v0, %v716_v6  ;;  %v623_v39 = vld [vmem:[#allocation2 + $0x20] sm:$0xff] }
 0x1b6   :  { %v774_v55 = vld [vmem:[#allocation4 + $0x18] sm:$0xff]  ;;  %613 = vst.msk [vmem:[#allocation4 + $0x28] sm:$0xff] %vm33_vm9, %v605_v18  ;;  %v1901_v50 = vmul.f32 %v1777_v47, %v622_v43  ;;  %v814_v47 = vsel %vm1843_vm11, %v1837_v35, %v809_v40  ;;  %vm1967_vm11 = vcmp.eq.f32.partialorder %v736_v30, 8.507059e+37 }
 0x1b7   :  { %v1828_v28 = vadd.f32 1e-05, %v774_v55  ;;  %568 = vst.msk [vmem:[#allocation3] sm:$0xff] %vm33_vm9, %v560_v23  ;;  %1040 = vrcp.f32 %v1797_v1  ;;  %v724_v23 = vand.u32 2147483648, %v1699_v46  ;;  %v524_v55 = vld [vmem:[#allocation3 + $0x20] sm:$0xff]  ;;  %vm890_vm13 = vweird.f32 %v1797_v1 }
 0x1b9   :  { %1042 = vrcp.f32 %v1828_v28  ;;  %v1931_v15 = vor.u32 1.1754944e-38, %v724_v23  ;;  %v838_v52 = vand.u32 2147483647, %v1828_v28  ;;  %vm834_vm10 = vweird.f32 %v1828_v28 }
 0x1ba   :  { %1044 = vrcp.f32 %v1817_v58  ;;  %v547_v60 = vpop.xlane.xlu1 %546  ;;  %v551_v2 = vpop.xlane.xlu0 %550 }
 0x1bb   :  { %v561_v12 = vadd.f32 %v547_v60, %v521_v16  ;;  %v470_v36 = vpop.xlane.xlu2 %469  ;;  %v563_v4 = vadd.f32 %v551_v2, %v523_v41  ;;  %vm839_vm12 = vcmp.eq.f32.partialorder %v838_v52, 8.507059e+37 }
 0x1bc   :  { %v775_v5 = vld [vmem:[#allocation4 + $0x20] sm:$0xff]  ;;  %v478_v9 = vadd.f32 %v470_v36, %v430_v51  ;;  %v1944_v36 = vmul.f32 %v1781_v53, %v623_v39 }
 0x1bd   :  { %v1861_v11 = vadd.f32 1e-05, %v775_v5  ;;  %v776_v13 = vld [vmem:[#allocation4 + $0x28] sm:$0xff]  ;;  %569 = vst.msk [vmem:[#allocation3 + $0x8] sm:$0xff] %vm33_vm9, %v561_v12  ;;  %v1870_v33 = vpop.eup %1040  ;;  %v721_v5 = vsel %vm1927_vm7, %v1786_v0, %v1915_v38 }
 0x1be   :  { %v1872_v18 = vadd.f32 1e-05, %v776_v13  ;;  %v763_v19 = vld [vmem:[#allocation3] sm:$0xff]  ;;  %487 = vst.msk [vmem:[#allocation2 + $0x38] sm:$0xff] %vm33_vm9, %v478_v9  ;;  %v886_v29 = vmul.f32 %v1870_v33, %v1797_v1  ;;  %vm891_vm4 = vweird.f32 %v1870_v33  ;;  %v726_v63 = vsel %vm1978_vm14, %v1931_v15, %v721_v5 }
 0x1bf   :  { %v1886_v49 = vpop.eup %1042  ;;  %1046 = vrcp.f32 %v1861_v11  ;;  %v899_v26 = vmul.f32 %v800_v48, %v763_v19  ;;  %571 = vst.msk [vmem:[#allocation3 + $0x18] sm:$0xff] %vm33_vm9, %v563_v4  ;;  %v854_v44 = vand.u32 2147483648, %v1861_v11  ;;  %vm848_vm1 = vweird.f32 %v1861_v11 }
 0x1c0   :  { %v1894_v25 = vpop.eup %1044  ;;  %v830_v27 = vmul.f32 %v1886_v49, %v1828_v28  ;;  %1048 = vrcp.f32 %v1872_v18  ;;  %vm835_vm8 = vweird.f32 %v1886_v49  ;;  %v887_v9 = vsub.f32 1.0, %v886_v29 }
 0x1c1   :  { %v907_v34 = vadd.f32 %v899_v26, %v1775_v14  ;;  %v823_v14 = vsel %vm1910_vm6, %v1760_v17, %v819_v21  ;;  %v872_v35 = vmul.f32 %v1894_v25, %v1817_v58  ;;  %v840_v17 = vand.u32 2147483648, %v1828_v28  ;;  %vm836_vm0 = vmor %vm834_vm10, %vm835_vm8  ;;  %v527_v26 = vld [vmem:[#allocation3 + $0x38] sm:$0xff] }
 0x1c2   :  { %v831_v41 = vsub.f32 1.0, %v830_v27  ;;  %v553_v51 = vpop.xlane.xlu1 %552  ;;  %v466_v45 = vpop.xlane.xlu0 %465  ;;  %v828_v53 = vsel %vm1864_vm3, %v827_v62, %v823_v14  ;;  %v525_v27 = vld [vmem:[#allocation3 + $0x28] sm:$0xff]  ;;  %v526_v62 = vld [vmem:[#allocation3 + $0x30] sm:$0xff]  ;;  %vm877_vm8 = vweird.f32 %v1894_v25  ;;  %vm2006_vm10 = vmor %vm890_vm13, %vm891_vm4  ;;  %vm876_vm13 = vweird.f32 %v1817_v58 }
 0x1c3   :  { %915 = vst.msk [vmem:[%s2085_s8] sm:$0xff] %vm33_vm9, %v907_v34  ;;  %v564_v54 = vadd.f32 %v553_v51, %v524_v55  ;;  %v549_v48 = vpop.xlane.xlu2 %548  ;;  %v476_v46 = vadd.f32 %v466_v45, %v428_v3  ;;  %v841_v19 = vor.u32 1.1754944e-38, %v840_v17  ;;  %v873_v20 = vsub.f32 1.0, %v872_v35 }
 0x1c4   :  { %v764_v60 = vld [vmem:[#allocation3 + $0x8] sm:$0xff]  ;;  %v832_v2 = vmul.f32 %v1886_v49, %v831_v41  ;;  %v562_v61 = vadd.f32 %v549_v48, %v522_v59  ;;  %v852_v34 = vand.u32 2147483647, %v1861_v11  ;;  %v855_v17 = vor.u32 1.1754944e-38, %v854_v44 }
 0x1c5   :  { %v1047_v12 = vpop.eup %1046  ;;  %v900_v4 = vmul.f32 %v814_v47, %v764_v60  ;;  %572 = vst.msk [vmem:[#allocation3 + $0x20] sm:$0xff] %vm33_vm9, %v564_v54  ;;  %v874_v41 = vmul.f32 %v1894_v25, %v873_v20  ;;  %v896_v60 = vand.u32 2147483648, %v1797_v1 }
 0x1c6   :  { %v1951_v10 = vpop.eup %1048  ;;  %v844_v13 = vmul.f32 %v1047_v12, %v1861_v11  ;;  %v833_v6 = vadd.f32 %v1886_v49, %v832_v2  ;;  %570 = vst.msk [vmem:[#allocation3 + $0x10] sm:$0xff] %vm33_vm9, %v562_v61  ;;  %v766_v40 = vld [vmem:[#allocation3 + $0x18] sm:$0xff]  ;;  %vm849_vm3 = vweird.f32 %v1047_v12  ;;  %v894_v11 = vand.u32 2147483647, %v1797_v1 }
 0x1c7   :  { %v858_v23 = vmul.f32 %v1951_v10, %v1872_v18  ;;  %v908_v43 = vadd.f32 %v900_v4, %v1815_v32  ;;  %485 = vst.msk [vmem:[#allocation2 + $0x28] sm:$0xff] %vm33_vm9, %v476_v46  ;;  %vm850_vm2 = vmor %vm848_vm1, %vm849_vm3  ;;  %vm853_vm5 = vcmp.eq.f32.partialorder %v852_v34, 8.507059e+37  ;;  %vm863_vm6 = vweird.f32 %v1951_v10 }
 0x1c8   :  { %v837_v37 = vsel %vm836_vm0, %v1886_v49, %v833_v6  ;;  %v845_v21 = vsub.f32 1.0, %v844_v13  ;;  %v888_v49 = vmul.f32 %v1870_v33, %v887_v9  ;;  %v868_v13 = vand.u32 2147483648, %v1872_v18  ;;  %vm2045_vm1 = vmor %vm876_vm13, %vm877_vm8 }
 0x1c9   :  { %916 = vst.msk [vmem:[%s2085_s8 + $0x8] sm:$0xff] %vm33_vm9, %v908_v43  ;;  %v842_v32 = vsel %vm839_vm12, %v841_v19, %v837_v37  ;;  %v859_v55 = vsub.f32 1.0, %v858_v23  ;;  %v875_v6 = vadd.f32 %v1894_v25, %v874_v41  ;;  %vm862_vm0 = vweird.f32 %v1872_v18  ;;  %v626_v23 = vld [vmem:[#allocation2 + $0x38] sm:$0xff] }
 0x1ca   :  { %v902_v3 = vmul.f32 %v842_v32, %v766_v40  ;;  %v846_v29 = vmul.f32 %v1047_v12, %v845_v21  ;;  %v559_v59 = vpop.xlane.xlu1 %558  ;;  %v557_v16 = vpop.xlane.xlu0 %556  ;;  %v889_v48 = vadd.f32 %v1870_v33, %v888_v49  ;;  %v882_v1 = vand.u32 2147483648, %v1817_v58  ;;  %vm2026_vm12 = vmor %vm862_vm0, %vm863_vm6 }
 0x1cb   :  { %v567_v39 = vadd.f32 %v559_v59, %v527_v26  ;;  %v860_v7 = vmul.f32 %v1951_v10, %v859_v55  ;;  %v555_v47 = vpop.xlane.xlu2 %554  ;;  %v566_v35 = vadd.f32 %v557_v16, %v526_v62  ;;  %v897_v19 = vor.u32 1.1754944e-38, %v896_v60 }
 0x1cc   :  { %v910_v51 = vadd.f32 %v902_v3, %v1901_v50  ;;  %v847_v14 = vadd.f32 %v1047_v12, %v846_v29  ;;  %v565_v45 = vadd.f32 %v555_v47, %v525_v27  ;;  %v767_v52 = vld [vmem:[#allocation3 + $0x20] sm:$0xff]  ;;  %vm895_vm3 = vcmp.eq.f32.partialorder %v894_v11, 8.507059e+37 }
 0x1cd   :  { %v765_v54 = vld [vmem:[#allocation3 + $0x10] sm:$0xff]  ;;  %575 = vst.msk [vmem:[#allocation3 + $0x38] sm:$0xff] %vm33_vm9, %v567_v39  ;;  %v861_v61 = vadd.f32 %v1951_v10, %v860_v7  ;;  %v762_v28 = vmul.f32 %v1857_v8, %v626_v23  ;;  %v883_v57 = vor.u32 1.1754944e-38, %v882_v1 }
 0x1ce   :  { %918 = vst.msk [vmem:[%s2085_s8 + $0x18] sm:$0xff] %vm33_vm9, %v910_v51  ;;  %v851_v50 = vsel %vm850_vm2, %v1047_v12, %v847_v14  ;;  %v901_v46 = vmul.f32 %v828_v53, %v765_v54  ;;  %v893_v53 = vsel %vm2006_vm10, %v1870_v33, %v889_v48  ;;  %v880_v33 = vand.u32 2147483647, %v1817_v58  ;;  %v624_v22 = vld [vmem:[#allocation2 + $0x28] sm:$0xff] }
 0x1cf   :  { %v856_v2 = vsel %vm853_vm5, %v855_v17, %v851_v50  ;;  %573 = vst.msk [vmem:[#allocation3 + $0x28] sm:$0xff] %vm33_vm9, %v565_v45  ;;  %v898_v24 = vsel %vm895_vm3, %v897_v19, %v893_v53  ;;  %v879_v58 = vsel %vm2045_vm1, %v1894_v25, %v875_v6  ;;  %v760_v38 = vmul.f32 %v726_v63, %v624_v22 }
 0x1d0   :  { %v903_v4 = vmul.f32 %v856_v2, %v767_v52  ;;  %v909_v9 = vadd.f32 %v901_v46, %v1854_v56  ;;  %574 = vst.msk [vmem:[#allocation3 + $0x30] sm:$0xff] %vm33_vm9, %v566_v35  ;;  %v866_v56 = vand.u32 2147483647, %v1872_v18  ;;  %v740_v18 = vsel %vm1967_vm11, %v1754_v42, %v735_v31 }
 0x1d1   :  { %v869_v31 = vor.u32 1.1754944e-38, %v868_v13  ;;  %vm881_vm7 = vcmp.eq.f32.partialorder %v880_v33, 8.507059e+37 }
 0x1d2   :  { %v911_v43 = vadd.f32 %v903_v4, %v1944_v36  ;;  %917 = vst.msk [vmem:[%s2085_s8 + $0x10] sm:$0xff] %vm33_vm9, %v909_v9  ;;  %v865_v36 = vsel %vm2026_vm12, %v1951_v10, %v861_v61  ;;  %v625_v10 = vld [vmem:[#allocation2 + $0x30] sm:$0xff]  ;;  %vm867_vm15 = vcmp.eq.f32.partialorder %v866_v56, 8.507059e+37  ;;  %v884_v5 = vsel %vm881_vm7, %v883_v57, %v879_v58 }
 0x1d3   :  { %v870_v26 = vsel %vm867_vm15, %v869_v31, %v865_v36  ;;  %v761_v44 = vmul.f32 %v740_v18, %v625_v10 }
 0x1d4   :  { %919 = vst.msk [vmem:[%s2085_s8 + $0x20] sm:$0xff] %vm33_vm9, %v911_v43  ;;  %v770_v42 = vld [vmem:[#allocation3 + $0x38] sm:$0xff] }
 0x1d5   :  { %v906_v21 = vmul.f32 %v898_v24, %v770_v42 }
 0x1d6   :  { %v768_v0 = vld [vmem:[#allocation3 + $0x28] sm:$0xff] }
 0x1d7   :  { %v914_v32 = vadd.f32 %v906_v21, %v762_v28  ;;  %v904_v15 = vmul.f32 %v870_v26, %v768_v0  ;;  %v769_v40 = vld [vmem:[#allocation3 + $0x30] sm:$0xff] }
 0x1d8   :  { %v905_v30 = vmul.f32 %v884_v5, %v769_v40 }
 0x1d9   :  { %922 = vst.msk [vmem:[%s2085_s8 + $0x38] sm:$0xff] %vm33_vm9, %v914_v32  ;;  %v912_v25 = vadd.f32 %v904_v15, %v760_v38 }
 0x1da   :  { %v913_v8 = vadd.f32 %v905_v30, %v761_v44 }
 0x1db   :  { %920 = vst.msk [vmem:[%s2085_s8 + $0x28] sm:$0xff] %vm33_vm9, %v912_v25 }
 0x1dc   :  { %921 = vst.msk [vmem:[%s2085_s8 + $0x30] sm:$0xff] %vm33_vm9, %v913_v8 }

</bundles_post_ra>
